<compile_context>
chip_gen: v5e
topology: v5e:2x2
jax: 0.10.0
libtpu: 0.0.40
codegen_flags: <defaults>
</compile_context>

<pallas_src>
import jax
import jax.numpy as jnp
from jax.experimental import pallas as pl
from jax.experimental.pallas import tpu as pltpu

LEAKY_SLOPE = 0.01   # nn.LeakyReLU default
LN_EPS = 1e-5        # nn.LayerNorm default


def _leaky_relu(x):
    # slope in (0,1)  =>  LeakyReLU(x) == max(x, slope*x)
    return jnp.maximum(x, LEAKY_SLOPE * x)


# -----------------------------------------------------------------------------
# Kernel
# -----------------------------------------------------------------------------
def guided_spr_decoder_kernel(z_ref, a_ref,
                              wt1z_ref, wt1a_ref, wt2_ref,
                              wf1_ref, wf2_ref, bias_ref,
                              out_ref):
    f32 = jnp.float32
    bf16 = jnp.bfloat16

    F = z_ref.shape[1]
    H = wt1z_ref.shape[1]
    KH = wf1_ref.shape[1]          # (1 + n_heads) * H
    FD = wf2_ref.shape[1]          # F + 3 + 3 (+ 7)

    # Unpack the bias/LN pack (rows: bt1, bt2, ln_g, ln_b, bf1, bf2).
    bt1 = bias_ref[0:1, :H]
    bt2 = bias_ref[1:2, :F]
    ln_g = bias_ref[2:3, :F]
    ln_b = bias_ref[3:4, :F]
    bf1 = bias_ref[4:5, :KH]
    bf2 = bias_ref[5:6, :FD]

    z = z_ref[...].astype(bf16)    # (tb, F)
    a = a_ref[...].astype(bf16)    # (tb, A)

    # ---- transition: Linear(F+A, H) as a split dot (== cat([z, a]) @ W1)
    #      -> LeakyReLU -> Linear(H, F) -> LayerNorm(F) -> Tanh
    h = (jnp.dot(z, wt1z_ref[...], preferred_element_type=f32)
         + jnp.dot(a, wt1a_ref[...], preferred_element_type=f32)
         + bt1)
    h = _leaky_relu(h).astype(bf16)
    y = jnp.dot(h, wt2_ref[...], preferred_element_type=f32) + bt2
    mean = jnp.mean(y, axis=-1, keepdims=True)
    var = jnp.mean((y - mean) * (y - mean), axis=-1, keepdims=True)
    z1 = jnp.tanh((y - mean) * jax.lax.rsqrt(var + LN_EPS) * ln_g + ln_b)
    z1b = z1.astype(bf16)          # (tb, F)

    # ---- fused projection + accel/home(/pose) heads.
    # wf1 columns = [proj | accel | home | pose] first layers (head blocks are
    # row-zero-padded to F so everything consumes z1 directly).  wf2 is
    # block-diagonal, so one matmul yields [proj_pre | accel | home | pose].
    hf = _leaky_relu(jnp.dot(z1b, wf1_ref[...], preferred_element_type=f32)
                     + bf1).astype(bf16)
    o = jnp.dot(hf, wf2_ref[...], preferred_element_type=f32) + bf2
    lane = jax.lax.broadcasted_iota(jnp.int32, o.shape, 1)
    o = jnp.where(lane < F, jnp.tanh(o), o)          # Tanh only on the proj lanes
    out_ref[...] = o.astype(out_ref.dtype)


# -----------------------------------------------------------------------------
# Wrapper
# -----------------------------------------------------------------------------
def _pick_tile_b(B: int) -> int:
    """Single step for B <= 512; otherwise the largest divisor tile in
    [128, 512] rows (preferring multiples of 16 for bf16 sublane packing).
    Never shrinks below 128 rows just to create extra grid steps."""
    if B <= 512:
        return B
    for t in range(512, 127, -16):
        if B % t == 0:
            return t
    for t in range(512, 127, -8):
        if B % t == 0:
            return t
    return B   # no friendly divisor: fall back to a single full-height block


def guided_spr_decoder_forward(z, action, kp, *, tile_b=None,
                               out_dtype=jnp.bfloat16):
    """z: (B, feature_dim), action: (B, action_dim); kp: prepare_kernel_params()."""
    B, F = z.shape
    _, A = action.shape
    H = kp["wt1z"].shape[1]
    KH = kp["wf1"].shape[1]
    FD = kp["wf2"].shape[1]
    D = FD - F                      # 3 + 3 (+ 7)
    has_pose = D > 6

    # Stream inputs as bf16 (MXU operand dtype) regardless of caller dtype.
    z = z.astype(jnp.bfloat16)
    action = action.astype(jnp.bfloat16)

    if tile_b is None:
        tile_b = _pick_tile_b(B)
    assert B % tile_b == 0, "tile_b must divide the batch size"
    assert tile_b == B or tile_b % 8 == 0, \
        "tile_b must be a multiple of 8 when batch-tiling"

    kp_list = [kp["wt1z"], kp["wt1a"], kp["wt2"], kp["wf1"], kp["wf2"], kp["bias"]]

    macs = (F + A) * H + H * F + F * KH + KH * FD
    cost = pl.CostEstimate(
        flops=int(2 * B * macs),
        transcendentals=int(B * (F + FD) + B),      # transition tanh + fused tanh + rsqrt
        bytes_accessed=int(z.nbytes + action.nbytes
                           + B * FD * jnp.dtype(out_dtype).itemsize
                           + sum(int(p.nbytes) for p in kp_list)))

    row = lambda ncol: pl.BlockSpec((tile_b, ncol), lambda i: (i, 0))
    const = lambda arr: pl.BlockSpec(arr.shape, lambda i: (0, 0))

    out = pl.pallas_call(
        guided_spr_decoder_kernel,
        out_shape=jax.ShapeDtypeStruct((B, FD), out_dtype),
        grid=(B // tile_b,),
        in_specs=[row(F), row(A)] + [const(p) for p in kp_list],
        out_specs=row(FD),
        compiler_params=pltpu.CompilerParams(
            dimension_semantics=("parallel",)),
        cost_estimate=cost,
    )(z, action, *kp_list)

    proj = out[:, :F]
    accel = out[:, F:F + 3]
    home = out[:, F + 3:F + 6]
    pose = out[:, F + 6:F + 13] if has_pose else None
    return proj, (accel, home, pose)


# -----------------------------------------------------------------------------
# Parameters (PyTorch-style init, (in, out) transposed weights)
# -----------------------------------------------------------------------------
def init_params(key, action_dim, latent_dim, feature_dim, layers_dim, pixel_dim=None):
    assert len(layers_dim) == 1, "kernel supports a single hidden layer (module default [256])"
    H = layers_dim[0]
    A, L, F, P = action_dim, latent_dim, feature_dim, pixel_dim

    def linear(k, fan_in, fan_out):
        kw, kb = jax.random.split(k)
        bound = 1.0 / float(fan_in) ** 0.5
        w = jax.random.uniform(kw, (fan_in, fan_out), jnp.float32, -bound, bound)
        b = jax.random.uniform(kb, (1, fan_out), jnp.float32, -bound, bound)
        return w, b

    names_dims = [("t1", F + A, H), ("t2", H, F),
                  ("p1", F, H), ("p2", H, F),
                  ("a1", L, H), ("a2", H, 3),
                  ("h1", L, H), ("h2", H, 3)]
    if P is not None:
        names_dims += [("q1", P, H), ("q2", H, 7)]

    params = {}
    for name, fi, fo in names_dims:
        key, k = jax.random.split(key)
        w, b = linear(k, fi, fo)
        params[name + "_w"] = w
        params[name + "_b"] = b
    params["ln_g"] = jnp.ones((1, F), jnp.float32)
    params["ln_b"] = jnp.zeros((1, F), jnp.float32)
    return params


def prepare_kernel_params(p, feature_dim, latent_dim, pixel_dim=None):
    """Pack everything into 6 arrays: split transition W1, transition W2,
    fused proj+heads W1 (row-zero-padded), fused block-diagonal W2, and one
    (8, Wmax) f32 pack of all bias / LayerNorm vectors."""
    F, L, P = feature_dim, latent_dim, pixel_dim
    H = p["t1_w"].shape[1]
    assert F >= 2 * L, "feature_dim must be >= 2 * latent_dim"
    if P is not None:
        assert F >= P, "feature_dim must be >= pixel_dim"
    bf = lambda x: x.astype(jnp.bfloat16)

    def pad_rows(w, start):
        out = jnp.zeros((F, w.shape[1]), w.dtype)
        return out.at[start:start + w.shape[0]].set(w)

    # fused first layer columns: [proj | accel | home | pose]
    w1_blocks = [p["p1_w"], pad_rows(p["a1_w"], 0), pad_rows(p["h1_w"], L)]
    b1_blocks = [p["p1_b"], p["a1_b"], p["h1_b"]]
    w2_blocks = [p["p2_w"], p["a2_w"], p["h2_w"]]
    b2_blocks = [p["p2_b"], p["a2_b"], p["h2_b"]]
    if P is not None:
        w1_blocks.append(pad_rows(p["q1_w"], F - P))
        b1_blocks.append(p["q1_b"])
        w2_blocks.append(p["q2_w"])
        b2_blocks.append(p["q2_b"])

    n = len(w1_blocks)
    KH = n * H
    FD = sum(w.shape[1] for w in w2_blocks)        # F + 3 + 3 (+ 7)
    wf1 = jnp.concatenate(w1_blocks, axis=1)       # (F, n*H)
    bf1 = jnp.concatenate(b1_blocks, axis=1)       # (1, n*H)
    wf2 = jnp.zeros((KH, FD), jnp.float32)         # block-diagonal
    col = 0
    for j, w2 in enumerate(w2_blocks):
        wf2 = wf2.at[j * H:(j + 1) * H, col:col + w2.shape[1]].set(w2)
        col += w2.shape[1]
    bf2 = jnp.concatenate(b2_blocks, axis=1)       # (1, FD)

    # One pack for every 1-D parameter (rows: bt1, bt2, ln_g, ln_b, bf1, bf2).
    w_max = max(H, F, KH, FD)
    w_max = ((w_max + 127) // 128) * 128
    bias_pack = jnp.zeros((8, w_max), jnp.float32)
    for r, vec in enumerate([p["t1_b"][0], p["t2_b"][0], p["ln_g"][0],
                             p["ln_b"][0], bf1[0], bf2[0]]):
        bias_pack = bias_pack.at[r, :vec.shape[0]].set(vec)

    return {
        "wt1z": bf(p["t1_w"][:F]),
        "wt1a": bf(p["t1_w"][F:]),
        "wt2": bf(p["t2_w"]),
        "wf1": bf(wf1),
        "wf2": bf(wf2),
        "bias": bias_pack,
    }


# -----------------------------------------------------------------------------
# References
# -----------------------------------------------------------------------------
def kernel_reference(z, action, kp, out_dtype=jnp.bfloat16):
    """Pure-JAX mirror of the kernel math (same bf16 casts / fused weights)."""
    f32, bf16 = jnp.float32, jnp.bfloat16
    F = z.shape[1]
    H = kp["wt1z"].shape[1]
    KH = kp["wf1"].shape[1]
    FD = kp["wf2"].shape[1]
    b = kp["bias"]
    bt1, bt2 = b[0:1, :H], b[1:2, :F]
    ln_g, ln_b = b[2:3, :F], b[3:4, :F]
    bf1, bf2 = b[4:5, :KH], b[5:6, :FD]

    zb, ab = z.astype(bf16), action.astype(bf16)
    h = _leaky_relu(jnp.dot(zb, kp["wt1z"], preferred_element_type=f32)
                    + jnp.dot(ab, kp["wt1a"], preferred_element_type=f32)
                    + bt1).astype(bf16)
    y = jnp.dot(h, kp["wt2"], preferred_element_type=f32) + bt2
    mean = jnp.mean(y, axis=-1, keepdims=True)
    var = jnp.mean((y - mean) ** 2, axis=-1, keepdims=True)
    z1 = jnp.tanh((y - mean) * jax.lax.rsqrt(var + LN_EPS) * ln_g + ln_b)
    z1b = z1.astype(bf16)
    hf = _leaky_relu(jnp.dot(z1b, kp["wf1"], preferred_element_type=f32)
                     + bf1).astype(bf16)
    o = jnp.dot(hf, kp["wf2"], preferred_element_type=f32) + bf2
    lane = jnp.arange(FD)[None, :]
    o = jnp.where(lane < F, jnp.tanh(o), o)
    return o.astype(out_dtype)


def reference_forward_f32(z, action, p, latent_dim, pixel_dim=None):
    """Faithful f32 re-implementation of GuidedSPRDecoder.forward (PyTorch semantics)."""
    L, P = latent_dim, pixel_dim
    x = jnp.concatenate([z.astype(jnp.float32), action.astype(jnp.float32)], axis=1)
    h = _leaky_relu(x @ p["t1_w"] + p["t1_b"])
    y = h @ p["t2_w"] + p["t2_b"]
    mean = jnp.mean(y, axis=-1, keepdims=True)
    var = jnp.mean((y - mean) ** 2, axis=-1, keepdims=True)
    z1 = jnp.tanh((y - mean) / jnp.sqrt(var + LN_EPS) * p["ln_g"] + p["ln_b"])
    proj = jnp.tanh(_leaky_relu(z1 @ p["p1_w"] + p["p1_b"]) @ p["p2_w"] + p["p2_b"])
    zp, ze = z1[:, :L], z1[:, L:2 * L]
    accel = _leaky_relu(zp @ p["a1_w"] + p["a1_b"]) @ p["a2_w"] + p["a2_b"]
    home = _leaky_relu(ze @ p["h1_w"] + p["h1_b"]) @ p["h2_w"] + p["h2_b"]
    pose = None
    if P is not None:
        pose = _leaky_relu(z1[:, -P:] @ p["q1_w"] + p["q1_b"]) @ p["q2_w"] + p["q2_b"]
    return proj, (accel, home, pose)


# TODO(synk): hot_encode_action one-hot path is not implemented (module default
# hot_encode_action=False); actions are taken as already-continuous vectors.

# -----------------------------------------------------------------------------
if __name__ == "__main__":
    # Small shapes consistent with GuidedSPRDecoder(action_shape=(A,), latent_dim,
    # feature_dim, layers_dim, pixel_dim); feature_dim >= 2*latent_dim.
    B, A, L, F, P = 128, 4, 8, 32, 16
    layers_dim = [64]

    key = jax.random.PRNGKey(0)
    key, kz, ka = jax.random.split(key, 3)
    # Upstream encoder activations are streamed as bf16.
    z = jax.random.normal(kz, (B, F), jnp.float32).astype(jnp.bfloat16)
    action = jax.random.uniform(ka, (B, A), jnp.float32, -1.0, 1.0).astype(jnp.bfloat16)

    params = init_params(key, A, L, F, layers_dim, P)
    kparams = prepare_kernel_params(params, F, L, P)

    proj, (accel, home, pose) = guided_spr_decoder_forward(z, action, kparams)
    jax.block_until_ready((proj, accel, home, pose))

    assert proj.shape == (B, F) and accel.shape == (B, 3)
    assert home.shape == (B, 3) and pose.shape == (B, 7)

    # (1) tight check vs a pure-JAX mirror of the exact kernel math
    slab = kernel_reference(z, action, kparams).astype(jnp.float32)
    m_proj, m_accel = slab[:, :F], slab[:, F:F + 3]
    m_home, m_pose = slab[:, F + 3:F + 6], slab[:, F + 6:F + 13]
    for got, want, name in ((proj, m_proj, "proj"), (accel, m_accel, "accel"),
                            (home, m_home, "home"), (pose, m_pose, "pose")):
        assert jnp.allclose(got.astype(jnp.float32), want, atol=1e-2, rtol=1e-2), \
            f"kernel-mirror mismatch: {name}"

    # (2) loose check vs the f32 PyTorch-semantics reference (covers bf16 quantization)
    f_proj, (f_accel, f_home, f_pose) = reference_forward_f32(z, action, params, L, P)
    for got, want, name in ((proj, f_proj, "proj"), (accel, f_accel, "accel"),
                            (home, f_home, "home"), (pose, f_pose, "pose")):
        assert jnp.allclose(got.astype(jnp.float32), want, atol=5e-2, rtol=5e-2), \
            f"f32-reference mismatch: {name}"

    print("KERNEL_OK")
</pallas_src>

<mosaic_0001>
module attributes {stable_mosaic.version = 11 : i64} {
  func.func @guided_spr_decoder_kernel(%arg0: i32, %arg1: memref<128x32xbf16, #tpu.memory_space<vmem>>, %arg2: memref<128x4xbf16, #tpu.memory_space<vmem>>, %arg3: memref<32x64xbf16, #tpu.memory_space<vmem>>, %arg4: memref<4x64xbf16, #tpu.memory_space<vmem>>, %arg5: memref<64x32xbf16, #tpu.memory_space<vmem>>, %arg6: memref<32x256xbf16, #tpu.memory_space<vmem>>, %arg7: memref<256x45xbf16, #tpu.memory_space<vmem>>, %arg8: memref<8x256xf32, #tpu.memory_space<vmem>>, %arg9: memref<128x45xbf16, #tpu.memory_space<vmem>>) attributes {dimension_semantics = [#tpu.dimension_semantics<parallel>], iteration_bounds = array<i64: 1>, scalar_prefetch = 0 : i64, scratch_operands = 0 : i64, tpu.core_type = #tpu.core_type<tc>, window_params = [{transform_indices = @transform_0, window_bounds = array<i64: 128, 32>}, {transform_indices = @transform_1, window_bounds = array<i64: 128, 4>}, {pipeline_mode = #tpu.pipeline_mode<synchronous>, transform_indices = @transform_2, window_bounds = array<i64: 32, 64>}, {pipeline_mode = #tpu.pipeline_mode<synchronous>, transform_indices = @transform_3, window_bounds = array<i64: 4, 64>}, {pipeline_mode = #tpu.pipeline_mode<synchronous>, transform_indices = @transform_4, window_bounds = array<i64: 64, 32>}, {pipeline_mode = #tpu.pipeline_mode<synchronous>, transform_indices = @transform_5, window_bounds = array<i64: 32, 256>}, {pipeline_mode = #tpu.pipeline_mode<synchronous>, transform_indices = @transform_6, window_bounds = array<i64: 256, 45>}, {pipeline_mode = #tpu.pipeline_mode<synchronous>, transform_indices = @transform_7, window_bounds = array<i64: 8, 256>}, {transform_indices = @transform_8, window_bounds = array<i64: 128, 45>}]} {
    %c0 = arith.constant 0 : index
    %c0_0 = arith.constant 0 : index
    %0 = vector.load %arg8[%c0, %c0_0] : memref<8x256xf32, #tpu.memory_space<vmem>>, vector<1x64xf32>
    %c1 = arith.constant 1 : index
    %c0_1 = arith.constant 0 : index
    %1 = vector.load %arg8[%c1, %c0_1] : memref<8x256xf32, #tpu.memory_space<vmem>>, vector<1x32xf32>
    %c2 = arith.constant 2 : index
    %c0_2 = arith.constant 0 : index
    %2 = vector.load %arg8[%c2, %c0_2] : memref<8x256xf32, #tpu.memory_space<vmem>>, vector<1x32xf32>
    %c3 = arith.constant 3 : index
    %c0_3 = arith.constant 0 : index
    %3 = vector.load %arg8[%c3, %c0_3] : memref<8x256xf32, #tpu.memory_space<vmem>>, vector<1x32xf32>
    %c4 = arith.constant 4 : index
    %c0_4 = arith.constant 0 : index
    %4 = vector.load %arg8[%c4, %c0_4] : memref<8x256xf32, #tpu.memory_space<vmem>>, vector<1x256xf32>
    %c5 = arith.constant 5 : index
    %c0_5 = arith.constant 0 : index
    %5 = vector.load %arg8[%c5, %c0_5] : memref<8x256xf32, #tpu.memory_space<vmem>>, vector<1x45xf32>
    %c0_6 = arith.constant 0 : index
    %c0_7 = arith.constant 0 : index
    %6 = vector.load %arg1[%c0_6, %c0_7] : memref<128x32xbf16, #tpu.memory_space<vmem>>, vector<128x32xbf16>
    %c0_8 = arith.constant 0 : index
    %c0_9 = arith.constant 0 : index
    %7 = vector.load %arg2[%c0_8, %c0_9] : memref<128x4xbf16, #tpu.memory_space<vmem>>, vector<128x4xbf16>
    %c0_10 = arith.constant 0 : index
    %c0_11 = arith.constant 0 : index
    %8 = vector.load %arg3[%c0_10, %c0_11] : memref<32x64xbf16, #tpu.memory_space<vmem>>, vector<32x64xbf16>
    %cst = arith.constant dense<0.000000e+00> : vector<128x64xf32>
    %9 = tpu.matmul %6, %8, %cst {dimension_numbers = #tpu.dot_dimension_numbers<[1], [0], [0], [1], [0, 0, 1, 1], [], []>} : vector<128x32xbf16>, vector<32x64xbf16>, vector<128x64xf32> -> vector<128x64xf32>
    %c0_12 = arith.constant 0 : index
    %c0_13 = arith.constant 0 : index
    %10 = vector.load %arg4[%c0_12, %c0_13] : memref<4x64xbf16, #tpu.memory_space<vmem>>, vector<4x64xbf16>
    %cst_14 = arith.constant dense<0.000000e+00> : vector<128x64xf32>
    %11 = tpu.matmul %7, %10, %cst_14 {dimension_numbers = #tpu.dot_dimension_numbers<[1], [0], [0], [1], [0, 0, 1, 1], [], []>} : vector<128x4xbf16>, vector<4x64xbf16>, vector<128x64xf32> -> vector<128x64xf32>
    %12 = arith.addf %9, %11 : vector<128x64xf32>
    %13 = vector.broadcast %0 : vector<1x64xf32> to vector<128x64xf32>
    %14 = arith.addf %12, %13 : vector<128x64xf32>
    %cst_15 = arith.constant 0.00999999977 : f32
    %15 = vector.broadcast %cst_15 : f32 to vector<128x64xf32>
    %16 = arith.mulf %15, %14 : vector<128x64xf32>
    %17 = arith.maximumf %14, %16 : vector<128x64xf32>
    %18 = arith.truncf %17 : vector<128x64xf32> to vector<128x64xbf16>
    %c0_16 = arith.constant 0 : index
    %c0_17 = arith.constant 0 : index
    %19 = vector.load %arg5[%c0_16, %c0_17] : memref<64x32xbf16, #tpu.memory_space<vmem>>, vector<64x32xbf16>
    %cst_18 = arith.constant dense<0.000000e+00> : vector<128x32xf32>
    %20 = tpu.matmul %18, %19, %cst_18 {dimension_numbers = #tpu.dot_dimension_numbers<[1], [0], [0], [1], [0, 0, 1, 1], [], []>} : vector<128x64xbf16>, vector<64x32xbf16>, vector<128x32xf32> -> vector<128x32xf32>
    %21 = vector.broadcast %1 : vector<1x32xf32> to vector<128x32xf32>
    %22 = arith.addf %20, %21 : vector<128x32xf32>
    %cst_19 = arith.constant dense<0.000000e+00> : vector<128xf32>
    %23 = vector.multi_reduction <add>, %22, %cst_19 [1] : vector<128x32xf32> to vector<128xf32>
    %24 = vector.shape_cast %23 : vector<128xf32> to vector<128x1xf32>
    %cst_20 = arith.constant 3.200000e+01 : f32
    %25 = vector.broadcast %cst_20 : f32 to vector<128x1xf32>
    %26 = arith.divf %24, %25 : vector<128x1xf32>
    %27 = vector.broadcast %26 : vector<128x1xf32> to vector<128x32xf32>
    %28 = arith.subf %22, %27 : vector<128x32xf32>
    %29 = vector.broadcast %26 : vector<128x1xf32> to vector<128x32xf32>
    %30 = arith.subf %22, %29 : vector<128x32xf32>
    %31 = arith.mulf %28, %30 : vector<128x32xf32>
    %cst_21 = arith.constant dense<0.000000e+00> : vector<128xf32>
    %32 = vector.multi_reduction <add>, %31, %cst_21 [1] : vector<128x32xf32> to vector<128xf32>
    %33 = vector.shape_cast %32 : vector<128xf32> to vector<128x1xf32>
    %cst_22 = arith.constant 3.200000e+01 : f32
    %34 = vector.broadcast %cst_22 : f32 to vector<128x1xf32>
    %35 = arith.divf %33, %34 : vector<128x1xf32>
    %36 = vector.broadcast %26 : vector<128x1xf32> to vector<128x32xf32>
    %37 = arith.subf %22, %36 : vector<128x32xf32>
    %cst_23 = arith.constant 9.99999974E-6 : f32
    %38 = vector.broadcast %cst_23 : f32 to vector<128x1xf32>
    %39 = arith.addf %35, %38 : vector<128x1xf32>
    %40 = math.rsqrt %39 : vector<128x1xf32>
    %41 = vector.broadcast %40 : vector<128x1xf32> to vector<128x32xf32>
    %42 = arith.mulf %37, %41 : vector<128x32xf32>
    %43 = vector.broadcast %2 : vector<1x32xf32> to vector<128x32xf32>
    %44 = arith.mulf %42, %43 : vector<128x32xf32>
    %45 = vector.broadcast %3 : vector<1x32xf32> to vector<128x32xf32>
    %46 = arith.addf %44, %45 : vector<128x32xf32>
    %47 = math.tanh %46 : vector<128x32xf32>
    %48 = arith.truncf %47 : vector<128x32xf32> to vector<128x32xbf16>
    %c0_24 = arith.constant 0 : index
    %c0_25 = arith.constant 0 : index
    %49 = vector.load %arg6[%c0_24, %c0_25] : memref<32x256xbf16, #tpu.memory_space<vmem>>, vector<32x256xbf16>
    %cst_26 = arith.constant dense<0.000000e+00> : vector<128x256xf32>
    %50 = tpu.matmul %48, %49, %cst_26 {dimension_numbers = #tpu.dot_dimension_numbers<[1], [0], [0], [1], [0, 0, 1, 1], [], []>} : vector<128x32xbf16>, vector<32x256xbf16>, vector<128x256xf32> -> vector<128x256xf32>
    %51 = vector.broadcast %4 : vector<1x256xf32> to vector<128x256xf32>
    %52 = arith.addf %50, %51 : vector<128x256xf32>
    %cst_27 = arith.constant 0.00999999977 : f32
    %53 = vector.broadcast %cst_27 : f32 to vector<128x256xf32>
    %54 = arith.mulf %53, %52 : vector<128x256xf32>
    %55 = arith.maximumf %52, %54 : vector<128x256xf32>
    %56 = arith.truncf %55 : vector<128x256xf32> to vector<128x256xbf16>
    %c0_28 = arith.constant 0 : index
    %c0_29 = arith.constant 0 : index
    %57 = vector.load %arg7[%c0_28, %c0_29] : memref<256x45xbf16, #tpu.memory_space<vmem>>, vector<256x45xbf16>
    %cst_30 = arith.constant dense<0.000000e+00> : vector<128x45xf32>
    %58 = tpu.matmul %56, %57, %cst_30 {dimension_numbers = #tpu.dot_dimension_numbers<[1], [0], [0], [1], [0, 0, 1, 1], [], []>} : vector<128x256xbf16>, vector<256x45xbf16>, vector<128x45xf32> -> vector<128x45xf32>
    %59 = vector.broadcast %5 : vector<1x45xf32> to vector<128x45xf32>
    %60 = arith.addf %58, %59 : vector<128x45xf32>
    %61 = tpu.iota {dimensions = array<i32: 1>} : vector<128x45xi32>
    %c32_i32 = arith.constant 32 : i32
    %62 = vector.broadcast %c32_i32 : i32 to vector<128x45xi32>
    %63 = arith.cmpi slt, %61, %62 : vector<128x45xi32>
    %64 = math.tanh %60 : vector<128x45xf32>
    %65 = arith.select %63, %64, %60 : vector<128x45xi1>, vector<128x45xf32>
    %66 = arith.truncf %65 : vector<128x45xf32> to vector<128x45xbf16>
    %c0_31 = arith.constant 0 : index
    %c0_32 = arith.constant 0 : index
    %67 = vector.load %arg9[%c0_31, %c0_32] : memref<128x45xbf16, #tpu.memory_space<vmem>>, vector<128x45xbf16>
    tpu.vector_store %arg9[%c0_31, %c0_32], %66 {strides = array<i32>} : memref<128x45xbf16, #tpu.memory_space<vmem>>, vector<128x45xbf16>,
    return
  }
  func.func @transform_0(%arg0: i32) -> (i32, i32) {
    %c0_i32 = arith.constant 0 : i32
    %c0_i32_0 = arith.constant 0 : i32
    return %arg0, %c0_i32 : i32, i32
  }
  func.func @transform_1(%arg0: i32) -> (i32, i32) {
    %c0_i32 = arith.constant 0 : i32
    %c0_i32_0 = arith.constant 0 : i32
    return %arg0, %c0_i32 : i32, i32
  }
  func.func @transform_2(%arg0: i32) -> (i32, i32) {
    %c0_i32 = arith.constant 0 : i32
    %c0_i32_0 = arith.constant 0 : i32
    %c0_i32_1 = arith.constant 0 : i32
    return %c0_i32, %c0_i32_0 : i32, i32
  }
  func.func @transform_3(%arg0: i32) -> (i32, i32) {
    %c0_i32 = arith.constant 0 : i32
    %c0_i32_0 = arith.constant 0 : i32
    %c0_i32_1 = arith.constant 0 : i32
    return %c0_i32, %c0_i32_0 : i32, i32
  }
  func.func @transform_4(%arg0: i32) -> (i32, i32) {
    %c0_i32 = arith.constant 0 : i32
    %c0_i32_0 = arith.constant 0 : i32
    %c0_i32_1 = arith.constant 0 : i32
    return %c0_i32, %c0_i32_0 : i32, i32
  }
  func.func @transform_5(%arg0: i32) -> (i32, i32) {
    %c0_i32 = arith.constant 0 : i32
    %c0_i32_0 = arith.constant 0 : i32
    %c0_i32_1 = arith.constant 0 : i32
    return %c0_i32, %c0_i32_0 : i32, i32
  }
  func.func @transform_6(%arg0: i32) -> (i32, i32) {
    %c0_i32 = arith.constant 0 : i32
    %c0_i32_0 = arith.constant 0 : i32
    %c0_i32_1 = arith.constant 0 : i32
    return %c0_i32, %c0_i32_0 : i32, i32
  }
  func.func @transform_7(%arg0: i32) -> (i32, i32) {
    %c0_i32 = arith.constant 0 : i32
    %c0_i32_0 = arith.constant 0 : i32
    %c0_i32_1 = arith.constant 0 : i32
    return %c0_i32, %c0_i32_0 : i32, i32
  }
  func.func @transform_8(%arg0: i32) -> (i32, i32) {
    %c0_i32 = arith.constant 0 : i32
    %c0_i32_0 = arith.constant 0 : i32
    return %arg0, %c0_i32 : i32, i32
  }
}

</mosaic_0001>

<bundles_post_ra>
// kernel: tpu_custom_call.1
= control target key start
LH: loop header
LB: loop body
LE: loop exit
PB: predicated region body
PF: predicated region fallthrough
CT: control target
= control target key end

     0   :  { %vm139_vm0 = vcmask 1041408   ;;  %vm114_vm1 = vcmask 31744   ;;  %vm244_vm2 = vcmask 261120   ;;  %vm406_vm3 = vcmask 523264   ;;  %s2449_s3 = inlined_call_operand.vmem [shape: bf16[4,64], index: 3, kind: input, shape index: {}]   ;;  %s2450_s2 = inlined_call_operand.vmem [shape: bf16[32,64], index: 2, kind: input, shape index: {}]   ;;  %s2451_s1 = inlined_call_operand.vmem [shape: bf16[128,4], index: 1, kind: input, shape index: {}]   ;;  %s2452_s0 = inlined_call_operand.vmem [shape: bf16[128,32], index: 0, kind: input, shape index: {}]   ;;  %s2453_s4 = inlined_call_operand.vmem [shape: bf16[64,32], index: 4, kind: input, shape index: {}]   ;;  %s2454_s7 = inlined_call_operand.vmem [shape: f32[8,256], index: 7, kind: input, shape index: {}]   ;;  %s2455_s5 = inlined_call_operand.vmem [shape: bf16[32,256], index: 5, kind: input, shape index: {}]   ;;  %s2456_s6 = inlined_call_operand.vmem [shape: bf16[256,45], index: 6, kind: input, shape index: {}]   ;;  %s2457_s8 = inlined_call_operand.vmem [shape: bf16[128,45], index: 8, kind: output, shape index: {}]  }
   0x1   :  { %v73_v0 = vld [vmem:[%s2449_s3] sm:$0x3]  ;;  %v1650_v1 = vld [vmem:[%s2450_s2 + $0x8] sm:$0xff]  ;;  %v1648_v3 = vld [vmem:[%s2451_s1 + $0x38] sm:$0xff] }
   0x2   :  { %v141_v2 = vsel %vm139_vm0, %v73_v0, 0  ;;  %1676 = vmatpush.bf16.msra.mxu2 %v1650_v1  ;;  %v1649_v4 = vld [vmem:[%s2450_s2] sm:$0xff]  ;;  %v1635_v6 = vld [vmem:[%s2452_s0 + $0x10] sm:$0xff]  ;;  %v1642_v8 = vld [vmem:[%s2451_s1 + $0x8] sm:$0xff] }
   0x3   :  { %1675 = vmatpush.bf16.msra.mxu1 %v141_v2  ;;  %v1641_v5 = vld [vmem:[%s2451_s1] sm:$0xff]  ;;  %150 = vmatpush.bf16.msra.mxu0 %v141_v2  ;;  %v1636_v9 = vld [vmem:[%s2452_s0 + $0x18] sm:$0xff]  ;;  %v1634_v11 = vld [vmem:[%s2452_s0 + $0x8] sm:$0xff] }
   0x4   :  { %v1633_v7 = vld [vmem:[%s2452_s0] sm:$0xff]  ;;  %v1654_v10 = vld [vmem:[%s2453_s4 + $0x18] sm:$0xff]  ;;  %v1643_v12 = vld [vmem:[%s2451_s1 + $0x10] sm:$0xff] }
   0x5   :  { %v1637_v13 = vld [vmem:[%s2452_s0 + $0x20] sm:$0xff]  ;;  %v1644_v14 = vld [vmem:[%s2451_s1 + $0x18] sm:$0xff]  ;;  %v1638_v15 = vld [vmem:[%s2452_s0 + $0x28] sm:$0xff] }
   0x6   :  { %1464 = vmatmul.msk.bf16.vlgmr.msra.gmra.mxu1 %vm114_vm1, %v1648_v3  ;;  %1677 = vmatpush.bf16.msra.mxu2 %v1649_v4  ;;  %v1653_v16 = vld [vmem:[%s2453_s4 + $0x10] sm:$0xff]  ;;  %v1645_v17 = vld [vmem:[%s2451_s1 + $0x20] sm:$0xff]  ;;  %v1652_v19 = vld [vmem:[%s2453_s4 + $0x8] sm:$0xff] }
   0x7   :  { %275 = vmatpush.bf16.msrb.mxu1 %v1650_v1  ;;  %1457 = vmatmul.msk.bf16.vlgmr.msra.gmra.mxu0 %vm114_vm1, %v1641_v5  ;;  %v1639_v18 = vld [vmem:[%s2452_s0 + $0x30] sm:$0xff]  ;;  %v1646_v20 = vld [vmem:[%s2451_s1 + $0x28] sm:$0xff]  ;;  %v1640_v21 = vld [vmem:[%s2452_s0 + $0x38] sm:$0xff] }
   0x8   :  { %v1647_v22 = vld [vmem:[%s2451_s1 + $0x30] sm:$0xff]  ;;  %v1651_v23 = vld [vmem:[%s2453_s4] sm:$0xff] }
   0x9   :  { %1507 = vmatmul.msk.bf16.vlgmr.msra.gmra.mxu2 %vm244_vm2, %v1635_v6  ;;  %v1917_v32 = vld [vmem:[%s2454_s7] ss:$0 sm:$0xff] }
   0xa   :  { %435 = vmatpush.bf16.msrb.mxu2 %v1654_v10 }
   0xb   :  { %276 = vmatpush.bf16.msrb.mxu1 %v1649_v4 }
   0xe   :  { %436 = vmatpush.bf16.msrb.mxu2 %v1653_v16 }
  0x12   :  { %437 = vmatpush.bf16.msrb.mxu2 %v1652_v19 }
  0x16   :  { %1505 = vmatmul.msk.bf16.vlgmr.msrb.gmra.mxu1 %vm244_vm2, %v1633_v7  ;;  %438 = vmatpush.bf16.msrb.mxu2 %v1651_v23 }
  0x17   :  { %1458 = vmatmul.msk.bf16.gmra.mxu0 %vm114_vm1, %v1642_v8 }
  0x19   :  { %1508 = vmatmul.msk.bf16.gmra.mxu2 %vm244_vm2, %v1636_v9 }
  0x26   :  { %1506 = vmatmul.msk.bf16.gmra.mxu1 %vm244_vm2, %v1634_v11 }
  0x27   :  { %1459 = vmatmul.msk.bf16.gmra.mxu0 %vm114_vm1, %v1643_v12 }
  0x29   :  { %1509 = vmatmul.msk.bf16.gmra.mxu2 %vm244_vm2, %v1637_v13 }
  0x37   :  { %1460 = vmatmul.msk.bf16.gmra.mxu0 %vm114_vm1, %v1644_v14 }
  0x39   :  { %1510 = vmatmul.msk.bf16.gmra.mxu2 %vm244_vm2, %v1638_v15 }
  0x47   :  { %1461 = vmatmul.msk.bf16.gmra.mxu0 %vm114_vm1, %v1645_v17 }
  0x49   :  { %1511 = vmatmul.msk.bf16.gmra.mxu2 %vm244_vm2, %v1639_v18 }
  0x57   :  { %1462 = vmatmul.msk.bf16.gmra.mxu0 %vm114_vm1, %v1646_v20 }
  0x59   :  { %1512 = vmatmul.msk.bf16.gmra.mxu2 %vm244_vm2, %v1640_v21 }
  0x67   :  { %1463 = vmatmul.msk.bf16.gmra.mxu0 %vm114_vm1, %v1647_v22 }
  0x83   :  { %v1910_v24 = vpop.f32.mrf.mxu1 }
  0x84   :  { %v152_v25 = vpop.f32.mrf.mxu0 }
  0x8b   :  { %v1912_v26 = vpop.f32.mrf.mxu1 }
  0x8c   :  { %v154_v27 = vpop.f32.mrf.mxu0  ;;  %v288_v28 = vpop.f32.mrf.mxu2 }
  0x93   :  { %v278_v29 = vpop.f32.mrf.mxu1 }
  0x94   :  { %v157_v30 = vpop.f32.mrf.mxu0  ;;  %v279_v31 = vadd.f32 %v278_v29, %v152_v25  ;;  %v290_v37 = vpop.f32.mrf.mxu2 }
  0x96   :  { %v318_v33 = vadd.f32 %v279_v31, %v1917_v32 }
  0x98   :  { %v334_v38 = vmul.f32 0.01, %v318_v33 }
  0x9a   :  { %v350_v41 = vmax.f32 %v318_v33, %v334_v38 }
  0x9b   :  { %v280_v34 = vpop.f32.mrf.mxu1 }
  0x9c   :  { %v281_v35 = vadd.f32 %v280_v34, %v154_v27  ;;  %v159_v36 = vpop.f32.mrf.mxu0  ;;  %v293_v47 = vpop.f32.mrf.mxu2 }
  0x9e   :  { %v319_v39 = vadd.f32 %v281_v35, %v1917_v32 }
  0xa0   :  { %v335_v40 = vmul.f32 0.01, %v319_v39 }
  0xa2   :  { %v351_v42 = vmax.f32 %v319_v39, %v335_v40 }
  0xa3   :  { %v283_v43 = vpop.f32.mrf.mxu1 }
  0xa4   :  { %v366_v44 = vpack.c.bf16 %v351_v42, %v350_v41  ;;  %v162_v45 = vpop.f32.mrf.mxu0  ;;  %v284_v46 = vadd.f32 %v283_v43, %v157_v30  ;;  %v295_v55 = vpop.f32.mrf.mxu2 }
  0xa5   :  { %v289_v58 = vadd.f32 %v288_v28, %v162_v45 }
  0xa6   :  { %1529 = vmatmul.msk.bf16.vlgmr.msrb.gmra.mxu2 %vm406_vm3, %v366_v44  ;;  %v320_v48 = vadd.f32 %v284_v46, %v1917_v32 }
  0xa7   :  { %v322_v62 = vadd.f32 %v289_v58, %v1917_v32 }
  0xa8   :  { %v336_v52 = vmul.f32 0.01, %v320_v48 }
  0xa9   :  { %v338_v1 = vmul.f32 0.01, %v322_v62 }
  0xaa   :  { %v352_v56 = vmax.f32 %v320_v48, %v336_v52 }
  0xab   :  { %v285_v49 = vpop.f32.mrf.mxu1  ;;  %v354_v4 = vmax.f32 %v322_v62, %v338_v1 }
  0xac   :  { %v286_v50 = vadd.f32 %v285_v49, %v159_v36  ;;  %v164_v51 = vpop.f32.mrf.mxu0  ;;  %v298_v0 = vpop.f32.mrf.mxu2 }
  0xad   :  { %v291_v59 = vadd.f32 %v290_v37, %v164_v51 }
  0xae   :  { %v321_v53 = vadd.f32 %v286_v50, %v1917_v32 }
  0xaf   :  { %v323_v63 = vadd.f32 %v291_v59, %v1917_v32 }
  0xb0   :  { %v337_v54 = vmul.f32 0.01, %v321_v53 }
  0xb1   :  { %v339_v2 = vmul.f32 0.01, %v323_v63 }
  0xb2   :  { %v353_v57 = vmax.f32 %v321_v53, %v337_v54 }
  0xb3   :  { %v355_v5 = vmax.f32 %v323_v63, %v339_v2 }
  0xb4   :  { %v367_v60 = vpack.c.bf16 %v353_v57, %v352_v56  ;;  %v167_v61 = vpop.f32.mrf.mxu0  ;;  %v300_v10 = vpop.f32.mrf.mxu2 }
  0xb5   :  { %v294_v6 = vadd.f32 %v293_v47, %v167_v61  ;;  %v368_v8 = vpack.c.bf16 %v355_v5, %v354_v4  ;;  %v1948_v4 = vld [vmem:[%s2454_s7 + $0x1] ss:$0 sm:$0xff] }
  0xb6   :  { %1530 = vmatmul.msk.bf16.gmra.mxu2 %vm406_vm3, %v367_v60 }
  0xb7   :  { %v324_v11 = vadd.f32 %v294_v6, %v1917_v32 }
  0xb9   :  { %v340_v13 = vmul.f32 0.01, %v324_v11 }
  0xbb   :  { %v356_v17 = vmax.f32 %v324_v11, %v340_v13 }
  0xbc   :  { %v169_v3 = vpop.f32.mrf.mxu0  ;;  %v303_v16 = vpop.f32.mrf.mxu2 }
  0xbd   :  { %v296_v7 = vadd.f32 %v295_v55, %v169_v3 }
  0xbf   :  { %v325_v12 = vadd.f32 %v296_v7, %v1917_v32 }
  0xc1   :  { %v341_v14 = vmul.f32 0.01, %v325_v12 }
  0xc3   :  { %v357_v18 = vmax.f32 %v325_v12, %v341_v14 }
  0xc4   :  { %v172_v9 = vpop.f32.mrf.mxu0  ;;  %v305_v27 = vpop.f32.mrf.mxu2 }
  0xc5   :  { %v299_v19 = vadd.f32 %v298_v0, %v172_v9  ;;  %v369_v21 = vpack.c.bf16 %v357_v18, %v356_v17 }
  0xc6   :  { %1531 = vmatmul.msk.bf16.gmra.mxu2 %vm406_vm3, %v368_v8 }
  0xc7   :  { %v326_v23 = vadd.f32 %v299_v19, %v1917_v32 }
  0xc9   :  { %v342_v28 = vmul.f32 0.01, %v326_v23 }
  0xcb   :  { %v358_v31 = vmax.f32 %v326_v23, %v342_v28 }
  0xcc   :  { %v174_v15 = vpop.f32.mrf.mxu0  ;;  %v308_v36 = vpop.f32.mrf.mxu2 }
  0xcd   :  { %v301_v20 = vadd.f32 %v300_v10, %v174_v15 }
  0xcf   :  { %v327_v25 = vadd.f32 %v301_v20, %v1917_v32 }
  0xd1   :  { %v343_v29 = vmul.f32 0.01, %v327_v25 }
  0xd3   :  { %v359_v33 = vmax.f32 %v327_v25, %v343_v29 }
  0xd4   :  { %v177_v22 = vpop.f32.mrf.mxu0  ;;  %v310_v43 = vpop.f32.mrf.mxu2 }
  0xd5   :  { %v304_v34 = vadd.f32 %v303_v16, %v177_v22  ;;  %v370_v37 = vpack.c.bf16 %v359_v33, %v358_v31  ;;  %v1779_v31 = vmov 32.0  }
  0xd6   :  { %1532 = vmatmul.msk.bf16.gmra.mxu2 %vm406_vm3, %v369_v21  ;;  %1681 = vrcp.f32 %v1779_v31 }
  0xd7   :  { %v328_v39 = vadd.f32 %v304_v34, %v1917_v32 }
  0xd9   :  { %v344_v41 = vmul.f32 0.01, %v328_v39 }
  0xdb   :  { %v360_v44 = vmax.f32 %v328_v39, %v344_v41 }
  0xdc   :  { %v179_v30 = vpop.f32.mrf.mxu0  ;;  %v313_v52 = vpop.f32.mrf.mxu2 }
  0xdd   :  { %v306_v35 = vadd.f32 %v305_v27, %v179_v30  ;;  %v314_v60 = vadd.f32 %v313_v52, %v1910_v24  ;;  %v1682_v33 = vpop.eup %1681 }
  0xde   :  { %v529_v34 = vmul.f32 32.0, %v1682_v33  ;;  %vm533_vm4 = vweird.f32 %v1682_v33 }
  0xdf   :  { %v329_v40 = vadd.f32 %v306_v35, %v1917_v32  ;;  %v332_v62 = vadd.f32 %v314_v60, %v1917_v32 }
  0xe0   :  { %v530_v35 = vsub.f32 1.0, %v529_v34 }
  0xe1   :  { %v345_v42 = vmul.f32 0.01, %v329_v40  ;;  %v348_v0 = vmul.f32 0.01, %v332_v62 }
  0xe3   :  { %v361_v45 = vmax.f32 %v329_v40, %v345_v42  ;;  %v364_v2 = vmax.f32 %v332_v62, %v348_v0 }
  0xe4   :  { %v182_v38 = vpop.f32.mrf.mxu0  ;;  %v315_v57 = vpop.f32.mrf.mxu2 }
  0xe5   :  { %v309_v47 = vadd.f32 %v308_v36, %v182_v38  ;;  %v371_v48 = vpack.c.bf16 %v361_v45, %v360_v44  ;;  %v316_v59 = vadd.f32 %v315_v57, %v1912_v26  ;;  %v531_v36 = vmul.f32 %v1682_v33, %v530_v35 }
  0xe6   :  { %1533 = vmatmul.msk.bf16.gmra.mxu2 %vm406_vm3, %v370_v37 }
  0xe7   :  { %v330_v50 = vadd.f32 %v309_v47, %v1917_v32  ;;  %v333_v61 = vadd.f32 %v316_v59, %v1917_v32  ;;  %v532_v37 = vadd.f32 %v1682_v33, %v531_v36 }
  0xe9   :  { %v346_v53 = vmul.f32 0.01, %v330_v50  ;;  %v349_v63 = vmul.f32 0.01, %v333_v61  ;;  %v1980_v38 = vsel %vm533_vm4, %v1682_v33, %v532_v37 }
  0xeb   :  { %v362_v55 = vmax.f32 %v330_v50, %v346_v53  ;;  %v365_v1 = vmax.f32 %v333_v61, %v349_v63 }
  0xec   :  { %v184_v46 = vpop.f32.mrf.mxu0 }
  0xed   :  { %v311_v49 = vadd.f32 %v310_v43, %v184_v46  ;;  %v373_v3 = vpack.c.bf16 %v365_v1, %v364_v2 }
  0xef   :  { %v331_v51 = vadd.f32 %v311_v49, %v1917_v32 }
  0xf1   :  { %v347_v54 = vmul.f32 0.01, %v331_v51 }
  0xf3   :  { %v363_v56 = vmax.f32 %v331_v51, %v347_v54 }
  0xf5   :  { %v372_v58 = vpack.c.bf16 %v363_v56, %v362_v55 }
  0xf6   :  { %1534 = vmatmul.msk.bf16.gmra.mxu2 %vm406_vm3, %v371_v48 }
 0x106   :  { %1535 = vmatmul.msk.bf16.gmra.mxu2 %vm406_vm3, %v372_v58 }
 0x116   :  { %1536 = vmatmul.msk.bf16.gmra.mxu2 %vm406_vm3, %v373_v3 }
 0x129   :  { %v440_v26 = vpop.f32.mrf.mxu2 }
 0x12a   :  { %v441_v24 = vadd.f32 %v440_v26, %v1948_v4 }
 0x12c   :  { %v480_v5 = vsel %vm244_vm2, %v441_v24, 0.0 }
 0x12d   :  { %481 = vadd.xlane.f32.xlu0 %v480_v5 }
 0x131   :  { %v442_v6 = vpop.f32.mrf.mxu2 }
 0x132   :  { %v443_v32 = vadd.f32 %v442_v6, %v1948_v4 }
 0x134   :  { %v483_v7 = vsel %vm244_vm2, %v443_v32, 0.0 }
 0x135   :  { %484 = vadd.xlane.f32.xlu0 %v483_v7 }
 0x139   :  { %v445_v8 = vpop.f32.mrf.mxu2 }
 0x13a   :  { %v446_v9 = vadd.f32 %v445_v8, %v1948_v4 }
 0x13c   :  { %v486_v10 = vsel %vm244_vm2, %v446_v9, 0.0 }
 0x13d   :  { %487 = vadd.xlane.f32.xlu1 %v486_v10 }
 0x141   :  { %v447_v11 = vpop.f32.mrf.mxu2 }
 0x142   :  { %v448_v12 = vadd.f32 %v447_v11, %v1948_v4 }
 0x144   :  { %v489_v13 = vsel %vm244_vm2, %v448_v12, 0.0 }
 0x145   :  { %490 = vadd.xlane.f32.xlu1 %v489_v13 }
 0x149   :  { %v450_v14 = vpop.f32.mrf.mxu2 }
 0x14a   :  { %v451_v15 = vadd.f32 %v450_v14, %v1948_v4 }
 0x14c   :  { %v492_v16 = vsel %vm244_vm2, %v451_v15, 0.0 }
 0x14d   :  { %493 = vadd.xlane.f32.xlu2 %v492_v16 }
 0x151   :  { %v452_v17 = vpop.f32.mrf.mxu2 }
 0x152   :  { %v1961_v18 = vadd.f32 %v452_v17, %v1948_v4 }
 0x154   :  { %v495_v19 = vsel %vm244_vm2, %v1961_v18, 0.0 }
 0x155   :  { %496 = vadd.xlane.f32.xlu2 %v495_v19 }
 0x159   :  { %v455_v20 = vpop.f32.mrf.mxu2 }
 0x15a   :  { %v1966_v21 = vadd.f32 %v455_v20, %v1948_v4 }
 0x15c   :  { %v498_v22 = vsel %vm244_vm2, %v1966_v21, 0.0 }
 0x15d   :  { %499 = vadd.xlane.f32.xlu0 %v498_v22 }
 0x161   :  { %v457_v23 = vpop.f32.mrf.mxu2 }
 0x162   :  { %v1971_v25 = vadd.f32 %v457_v23, %v1948_v4 }
 0x164   :  { %v501_v27 = vsel %vm244_vm2, %v1971_v25, 0.0 }
 0x165   :  { %502 = vadd.xlane.f32.xlu1 %v501_v27 }
 0x169   :  { %v460_v28 = vpop.f32.mrf.mxu2 }
 0x16a   :  { %v1976_v29 = vadd.f32 %v460_v28, %v1948_v4 }
 0x16c   :  { %v504_v30 = vsel %vm244_vm2, %v1976_v29, 0.0 }
 0x16d   :  { %505 = vadd.xlane.f32.xlu1 %v504_v30 }
 0x171   :  { %v462_v44 = vpop.f32.mrf.mxu2 }
 0x172   :  { %v1990_v47 = vadd.f32 %v462_v44, %v1948_v4 }
 0x174   :  { %v507_v50 = vsel %vm244_vm2, %v1990_v47, 0.0 }
 0x179   :  { %v465_v56 = vpop.f32.mrf.mxu2 }
 0x17a   :  { %v2013_v2 = vadd.f32 %v465_v56, %v1948_v4 }
 0x181   :  { %v467_v63 = vpop.f32.mrf.mxu2 }
 0x182   :  { %v2024_v8 = vadd.f32 %v467_v63, %v1948_v4 }
 0x184   :  { %v513_v11 = vsel %vm244_vm2, %v2024_v8, 0.0 }
 0x189   :  { %v470_v7 = vpop.f32.mrf.mxu2 }
 0x191   :  { %v472_v17 = vpop.f32.mrf.mxu2 }
 0x192   :  { %v2048_v27 = vadd.f32 %v472_v17, %v1948_v4 }
 0x194   :  { %v519_v33 = vsel %vm244_vm2, %v2048_v27, 0.0 }
 0x199   :  { %v475_v30 = vpop.f32.mrf.mxu2 }
 0x19a   :  { %v2060_v36 = vadd.f32 %v475_v30, %v1948_v4 }
 0x1a0   :  { %v482_v39 = vpop.xlane.xlu0 %481 }
 0x1a1   :  { %v535_v40 = vmul.f32 %v1980_v38, %v482_v39 }
 0x1a3   :  { %v1983_v41 = vsub.f32 %v441_v24, %v535_v40  ;;  %v510_v24 = vsel %vm244_vm2, %v2013_v2, 0.0  ;;  %v522_v40 = vsel %vm244_vm2, %v2060_v36, 0.0 }
 0x1a5   :  { %v567_v42 = vmul.f32 %v1983_v41, %v1983_v41 }
 0x1a7   :  { %v583_v43 = vsel %vm244_vm2, %v567_v42, 0.0  ;;  %v477_v42 = vpop.f32.mrf.mxu2 }
 0x1a8   :  { %584 = vadd.xlane.f32.xlu2 %v583_v43  ;;  %v485_v45 = vpop.xlane.xlu0 %484  ;;  %v2071_v43 = vadd.f32 %v477_v42, %v1948_v4 }
 0x1a9   :  { %v536_v46 = vmul.f32 %v1980_v38, %v485_v45 }
 0x1aa   :  { %v525_v44 = vsel %vm244_vm2, %v2071_v43, 0.0 }
 0x1ab   :  { %v1992_v48 = vsub.f32 %v443_v32, %v536_v46 }
 0x1ad   :  { %v568_v49 = vmul.f32 %v1992_v48, %v1992_v48 }
 0x1af   :  { %v586_v51 = vsel %vm244_vm2, %v568_v49, 0.0  ;;  %v1657_v49 = vld [vmem:[%s2455_s5 + $0x14] sm:$0xf] }
 0x1b0   :  { %v488_v52 = vpop.xlane.xlu1 %487  ;;  %508 = vadd.xlane.f32.xlu2 %v507_v50  ;;  %587 = vadd.xlane.f32.xlu0 %v586_v51  ;;  %v1549_v50 = vld [vmem:[%s2455_s5 + $0x18] sm:$0xf0] }
 0x1b1   :  { %v537_v53 = vmul.f32 %v1980_v38, %v488_v52  ;;  %v1552_v51 = vor.u32 %v1657_v49, %v1549_v50  ;;  %v1658_v52 = vld [vmem:[%s2455_s5 + $0x14] sm:$0xf0] }
 0x1b3   :  { %v2000_v54 = vsub.f32 %v446_v9, %v537_v53  ;;  %1003 = vmatpush.bf16.msrb.mxu0 %v1552_v51 }
 0x1b5   :  { %v569_v55 = vmul.f32 %v2000_v54, %v2000_v54 }
 0x1b7   :  { %v589_v57 = vsel %vm244_vm2, %v569_v55, 0.0 }
 0x1b8   :  { %v491_v58 = vpop.xlane.xlu1 %490  ;;  %590 = vadd.xlane.f32.xlu0 %v589_v57 }
 0x1b9   :  { %v538_v59 = vmul.f32 %v1980_v38, %v491_v58 }
 0x1bb   :  { %v2006_v60 = vsub.f32 %v448_v12, %v538_v59  ;;  %v1539_v59 = vld [vmem:[%s2455_s5] sm:$0xf] }
 0x1bd   :  { %v570_v61 = vmul.f32 %v2006_v60, %v2006_v60 }
 0x1bf   :  { %v592_v62 = vsel %vm244_vm2, %v570_v61, 0.0  ;;  %v1656_v61 = vld [vmem:[%s2455_s5 + $0x4] sm:$0xf0] }
 0x1c0   :  { %v494_v0 = vpop.xlane.xlu2 %493  ;;  %593 = vadd.xlane.f32.xlu1 %v592_v62  ;;  %v1655_v62 = vld [vmem:[%s2455_s5 + $0x4] sm:$0xf]  ;;  %v1540_v63 = vor.u32 %v1656_v61, %v1539_v59 }
 0x1c1   :  { %v539_v1 = vmul.f32 %v1980_v38, %v494_v0  ;;  %v1541_v0 = vld [vmem:[%s2455_s5 + $0x8] sm:$0xf0] }
 0x1c3   :  { %v2015_v3 = vsub.f32 %v451_v15, %v539_v1  ;;  %v2036_v15 = vadd.f32 %v470_v7, %v1948_v4  ;;  %v1547_v4 = vld [vmem:[%s2455_s5 + $0x10] sm:$0xf] }
 0x1c4   :  { %v1548_v53 = vor.u32 %v1658_v52, %v1547_v4 }
 0x1c5   :  { %v571_v26 = vmul.f32 %v2015_v3, %v2015_v3  ;;  %v516_v19 = vsel %vm244_vm2, %v2036_v15, 0.0 }
 0x1c6   :  { %954 = vmatpush.bf16.msra.mxu1 %v1548_v53  ;;  %1678 = vmatpush.bf16.msra.mxu3 %v1548_v53 }
 0x1c7   :  { %v595_v5 = vsel %vm244_vm2, %v571_v26, 0.0 }
 0x1c8   :  { %v497_v6 = vpop.xlane.xlu2 %496  ;;  %511 = vadd.xlane.f32.xlu1 %v510_v24  ;;  %596 = vadd.xlane.f32.xlu2 %v595_v5  ;;  %v1544_v5 = vor.u32 %v1655_v62, %v1541_v0 }
 0x1c9   :  { %v540_v32 = vmul.f32 %v1980_v38, %v497_v6 }
 0x1ca   :  { %955 = vmatpush.bf16.msra.mxu1 %v1540_v63  ;;  %1679 = vmatpush.bf16.msra.mxu3 %v1540_v63 }
 0x1cb   :  { %v2027_v9 = vsub.f32 %v1961_v18, %v540_v32  ;;  %1004 = vmatpush.bf16.msrb.mxu0 %v1544_v5 }
 0x1cd   :  { %v572_v10 = vmul.f32 %v2027_v9, %v2027_v9 }
 0x1cf   :  { %v598_v12 = vsel %vm244_vm2, %v572_v10, 0.0 }
 0x1d0   :  { %514 = vadd.xlane.f32.xlu2 %v513_v11  ;;  %599 = vadd.xlane.f32.xlu0 %v598_v12  ;;  %v500_v13 = vpop.xlane.xlu0 %499 }
 0x1d1   :  { %v541_v14 = vmul.f32 %v1980_v38, %v500_v13 }
 0x1d3   :  { %v2039_v16 = vsub.f32 %v1966_v21, %v541_v14 }
 0x1d5   :  { %v573_v18 = vmul.f32 %v2039_v16, %v2039_v16 }
 0x1d7   :  { %v601_v20 = vsel %vm244_vm2, %v573_v18, 0.0 }
 0x1d8   :  { %v503_v22 = vpop.xlane.xlu1 %502  ;;  %517 = vadd.xlane.f32.xlu2 %v516_v19  ;;  %602 = vadd.xlane.f32.xlu0 %v601_v20 }
 0x1d9   :  { %v542_v23 = vmul.f32 %v1980_v38, %v503_v22 }
 0x1db   :  { %v2051_v21 = vsub.f32 %v1971_v25, %v542_v23 }
 0x1dd   :  { %v574_v28 = vmul.f32 %v2051_v21, %v2051_v21 }
 0x1df   :  { %v604_v31 = vsel %vm244_vm2, %v574_v28, 0.0 }
 0x1e0   :  { %605 = vadd.xlane.f32.xlu1 %v604_v31  ;;  %v506_v34 = vpop.xlane.xlu1 %505  ;;  %520 = vadd.xlane.f32.xlu0 %v519_v33  ;;  %v2113_v31 = vld [vmem:[%s2454_s7 + $0x2] ss:$0 sm:$0xff] }
 0x1e1   :  { %v543_v35 = vmul.f32 %v1980_v38, %v506_v34 }
 0x1e3   :  { %v2063_v25 = vsub.f32 %v1976_v29, %v543_v35 }
 0x1e5   :  { %v575_v37 = vmul.f32 %v2063_v25, %v2063_v25 }
 0x1e7   :  { %v607_v39 = vsel %vm244_vm2, %v575_v37, 0.0 }
 0x1e8   :  { %608 = vadd.xlane.f32.xlu1 %v607_v39  ;;  %523 = vadd.xlane.f32.xlu0 %v522_v40 }
 0x1f0   :  { %526 = vadd.xlane.f32.xlu1 %v525_v44 }
 0x21b   :  { %v585_v29 = vpop.xlane.xlu2 %584 }
 0x21c   :  { %v631_v45 = vmul.f32 %v585_v29, %v1980_v38 }
 0x21e   :  { %v647_v46 = vadd.f32 1e-05, %v631_v45 }
 0x220   :  { %1683 = vrsqrt.f32 %v647_v46  ;;  %vm669_vm6 = vweird.f32 %v647_v46 }
 0x223   :  { %v509_v55 = vpop.xlane.xlu2 %508  ;;  %v588_v56 = vpop.xlane.xlu0 %587 }
 0x224   :  { %v544_v57 = vmul.f32 %v1980_v38, %v509_v55  ;;  %v632_v58 = vmul.f32 %v588_v56, %v1980_v38 }
 0x226   :  { %v1684_v1 = vpop.eup %1683  ;;  %v2103_v26 = vsub.f32 %v1990_v47, %v544_v57  ;;  %v648_v24 = vadd.f32 1e-05, %v632_v58 }
 0x227   :  { %v664_v6 = vmul.f32 %v1684_v1, %v647_v46  ;;  %vm670_vm5 = vweird.f32 %v1684_v1 }
 0x228   :  { %1685 = vrsqrt.f32 %v648_v24  ;;  %v576_v32 = vmul.f32 %v2103_v26, %v2103_v26  ;;  %vm671_vm7 = vmor %vm669_vm6, %vm670_vm5  ;;  %vm679_vm9 = vweird.f32 %v648_v24 }
 0x229   :  { %v665_v7 = vmul.f32 %v1684_v1, %v664_v6 }
 0x22a   :  { %v610_v10 = vsel %vm244_vm2, %v576_v32, 0.0 }
 0x22b   :  { %v666_v11 = vmul.f32 0.5, %v665_v7  ;;  %611 = vadd.xlane.f32.xlu2 %v610_v10  ;;  %v591_v12 = vpop.xlane.xlu0 %590 }
 0x22c   :  { %v633_v13 = vmul.f32 %v591_v12, %v1980_v38 }
 0x22d   :  { %v667_v47 = vsub.f32 1.5, %v666_v11 }
 0x22e   :  { %v1686_v14 = vpop.eup %1685  ;;  %v649_v17 = vadd.f32 1e-05, %v633_v13 }
 0x22f   :  { %v668_v18 = vmul.f32 %v1684_v1, %v667_v47  ;;  %v674_v19 = vmul.f32 %v1686_v14, %v648_v24  ;;  %vm680_vm8 = vweird.f32 %v1686_v14 }
 0x230   :  { %1687 = vrsqrt.f32 %v649_v17  ;;  %vm681_vm10 = vmor %vm679_vm9, %vm680_vm8  ;;  %vm689_vm12 = vweird.f32 %v649_v17 }
 0x231   :  { %v672_v20 = vsel %vm671_vm7, %v1684_v1, %v668_v18  ;;  %v675_v22 = vmul.f32 %v1686_v14, %v674_v19 }
 0x232   :  { %v823_v23 = vmul.f32 %v672_v20, %v1983_v41  ;;  %v2120_v41 = vld [vmem:[%s2454_s7 + $0x3] ss:$0 sm:$0xff] }
 0x233   :  { %v676_v28 = vmul.f32 0.5, %v675_v22  ;;  %v594_v30 = vpop.xlane.xlu1 %593 }
 0x234   :  { %v634_v33 = vmul.f32 %v594_v30, %v1980_v38  ;;  %v839_v39 = vmul.f32 %v823_v23, %v2113_v31 }
 0x235   :  { %v677_v34 = vsub.f32 1.5, %v676_v28 }
 0x236   :  { %v1688_v35 = vpop.eup %1687  ;;  %v650_v37 = vadd.f32 1e-05, %v634_v33  ;;  %v855_v46 = vadd.f32 %v839_v39, %v2120_v41 }
 0x237   :  { %v678_v40 = vmul.f32 %v1686_v14, %v677_v34  ;;  %v684_v42 = vmul.f32 %v1688_v35, %v649_v17  ;;  %vm690_vm11 = vweird.f32 %v1688_v35 }
 0x238   :  { %1689 = vrsqrt.f32 %v650_v37  ;;  %vm691_vm13 = vmor %vm689_vm12, %vm690_vm11  ;;  %vm699_vm15 = vweird.f32 %v650_v37 }
 0x239   :  { %v682_v44 = vsel %vm681_vm10, %v1686_v14, %v678_v40  ;;  %v685_v29 = vmul.f32 %v1688_v35, %v684_v42  ;;  %1691 = vtanh.f32 %v855_v46 }
 0x23a   :  { %v824_v45 = vmul.f32 %v682_v44, %v1992_v48 }
 0x23b   :  { %v686_v49 = vmul.f32 0.5, %v685_v29  ;;  %v512_v50 = vpop.xlane.xlu1 %511  ;;  %v597_v51 = vpop.xlane.xlu2 %596 }
 0x23c   :  { %v840_v4 = vmul.f32 %v824_v45, %v2113_v31  ;;  %v545_v52 = vmul.f32 %v1980_v38, %v512_v50  ;;  %v635_v53 = vmul.f32 %v597_v51, %v1980_v38 }
 0x23d   :  { %v687_v55 = vsub.f32 1.5, %v686_v49 }
 0x23e   :  { %v856_v56 = vadd.f32 %v840_v4, %v2120_v41  ;;  %v2129_v57 = vsub.f32 %v2013_v2, %v545_v52  ;;  %v651_v58 = vadd.f32 1e-05, %v635_v53  ;;  %v1690_v48 = vpop.eup %1689 }
 0x23f   :  { %v688_v59 = vmul.f32 %v1688_v35, %v687_v55  ;;  %v694_v61 = vmul.f32 %v1690_v48, %v650_v37  ;;  %v1692_v10 = vpop.eup %1691  ;;  %vm700_vm14 = vweird.f32 %v1690_v48 }
 0x240   :  { %1693 = vtanh.f32 %v856_v56  ;;  %v577_v63 = vmul.f32 %v2129_v57, %v2129_v57  ;;  %vm701_vm0 = vmor %vm699_vm15, %vm700_vm14  ;;  %vm709_vm3 = vweird.f32 %v651_v58 }
 0x241   :  { %v692_v62 = vsel %vm691_vm13, %v1688_v35, %v688_v59  ;;  %1695 = vrsqrt.f32 %v651_v58  ;;  %v695_v0 = vmul.f32 %v1690_v48, %v694_v61 }
 0x242   :  { %v825_v1 = vmul.f32 %v692_v62, %v2000_v54  ;;  %v613_v24 = vsel %vm244_vm2, %v577_v63, 0.0 }
 0x243   :  { %v515_v2 = vpop.xlane.xlu2 %514  ;;  %v600_v5 = vpop.xlane.xlu0 %599  ;;  %v696_v6 = vmul.f32 0.5, %v695_v0  ;;  %614 = vadd.xlane.f32.xlu2 %v613_v24 }
 0x244   :  { %v546_v32 = vmul.f32 %v1980_v38, %v515_v2  ;;  %v636_v7 = vmul.f32 %v600_v5, %v1980_v38  ;;  %v841_v54 = vmul.f32 %v825_v1, %v2113_v31 }
 0x245   :  { %v697_v12 = vsub.f32 1.5, %v696_v6 }
 0x246   :  { %v1694_v11 = vpop.eup %1693  ;;  %v2138_v13 = vsub.f32 %v2024_v8, %v546_v32  ;;  %v652_v47 = vadd.f32 1e-05, %v636_v7  ;;  %v857_v34 = vadd.f32 %v841_v54, %v2120_v41 }
 0x247   :  { %v1696_v14 = vpop.eup %1695  ;;  %v887_v17 = vpack.c.bf16 %v1694_v11, %v1692_v10  ;;  %v698_v18 = vmul.f32 %v1690_v48, %v697_v12 }
 0x248   :  { %v704_v19 = vmul.f32 %v1696_v14, %v651_v58  ;;  %1697 = vrsqrt.f32 %v652_v47  ;;  %v578_v20 = vmul.f32 %v2138_v13, %v2138_v13  ;;  %vm710_vm1 = vweird.f32 %v1696_v14 }
 0x249   :  { %1553 = vmatmul.msk.bf16.vlgmr.msra.gmra.mxu1 %vm244_vm2, %v887_v17  ;;  %1561 = vmatmul.msk.bf16.vlgmr.msrb.gmra.mxu0 %vm244_vm2, %v887_v17  ;;  %v702_v22 = vsel %vm701_vm0, %v1690_v48, %v698_v18  ;;  %1699 = vtanh.f32 %v857_v34  ;;  %vm711_vm4 = vmor %vm709_vm3, %vm710_vm1  ;;  %vm719_vm6 = vweird.f32 %v652_v47 }
 0x24a   :  { %v705_v8 = vmul.f32 %v1696_v14, %v704_v19  ;;  %v826_v23 = vmul.f32 %v702_v22, %v2006_v60  ;;  %v616_v30 = vsel %vm244_vm2, %v578_v20, 0.0 }
 0x24b   :  { %v518_v28 = vpop.xlane.xlu2 %517  ;;  %v603_v33 = vpop.xlane.xlu0 %602  ;;  %617 = vadd.xlane.f32.xlu0 %v616_v30 }
 0x24c   :  { %v706_v35 = vmul.f32 0.5, %v705_v8  ;;  %v547_v37 = vmul.f32 %v1980_v38, %v518_v28  ;;  %v637_v39 = vmul.f32 %v603_v33, %v1980_v38  ;;  %v842_v40 = vmul.f32 %v826_v23, %v2113_v31 }
 0x24e   :  { %v1698_v42 = vpop.eup %1697  ;;  %v707_v44 = vsub.f32 1.5, %v706_v35  ;;  %v2152_v29 = vsub.f32 %v2036_v15, %v547_v37  ;;  %v653_v60 = vadd.f32 1e-05, %v637_v39  ;;  %v858_v46 = vadd.f32 %v842_v40, %v2120_v41 }
 0x24f   :  { %v714_v45 = vmul.f32 %v1698_v42, %v652_v47  ;;  %v1700_v59 = vpop.eup %1699  ;;  %vm720_vm5 = vweird.f32 %v1698_v42 }
 0x250   :  { %v708_v49 = vmul.f32 %v1696_v14, %v707_v44  ;;  %1701 = vrsqrt.f32 %v653_v60  ;;  %v579_v50 = vmul.f32 %v2152_v29, %v2152_v29  ;;  %vm721_vm7 = vmor %vm719_vm6, %vm720_vm5  ;;  %vm729_vm9 = vweird.f32 %v653_v60 }
 0x251   :  { %v715_v51 = vmul.f32 %v1698_v42, %v714_v45  ;;  %1703 = vtanh.f32 %v858_v46 }
 0x252   :  { %v712_v4 = vsel %vm711_vm4, %v1696_v14, %v708_v49  ;;  %v619_v52 = vsel %vm244_vm2, %v579_v50, 0.0 }
 0x253   :  { %v716_v53 = vmul.f32 0.5, %v715_v51  ;;  %v606_v15 = vpop.xlane.xlu1 %605  ;;  %620 = vadd.xlane.f32.xlu1 %v619_v52  ;;  %v521_v55 = vpop.xlane.xlu0 %520  ;;  %v827_v56 = vmul.f32 %v712_v4, %v2015_v3 }
 0x254   :  { %v638_v48 = vmul.f32 %v606_v15, %v1980_v38  ;;  %v548_v58 = vmul.f32 %v1980_v38, %v521_v55 }
 0x255   :  { %v717_v61 = vsub.f32 1.5, %v716_v53  ;;  %v843_v5 = vmul.f32 %v827_v56, %v2113_v31 }
 0x256   :  { %v1702_v62 = vpop.eup %1701  ;;  %v654_v63 = vadd.f32 1e-05, %v638_v48  ;;  %v2162_v0 = vsub.f32 %v2048_v27, %v548_v58 }
 0x257   :  { %v1704_v1 = vpop.eup %1703  ;;  %v718_v24 = vmul.f32 %v1698_v42, %v717_v61  ;;  %v724_v2 = vmul.f32 %v1702_v62, %v653_v60  ;;  %v859_v17 = vadd.f32 %v843_v5, %v2120_v41  ;;  %vm730_vm8 = vweird.f32 %v1702_v62 }
 0x258   :  { %1705 = vrsqrt.f32 %v654_v63  ;;  %v888_v3 = vpack.c.bf16 %v1704_v1, %v1700_v59  ;;  %v580_v6 = vmul.f32 %v2162_v0, %v2162_v0  ;;  %vm731_vm10 = vmor %vm729_vm9, %vm730_vm8  ;;  %vm739_vm12 = vweird.f32 %v654_v63  ;;  %v1666_v59 = vld [vmem:[%s2456_s6 + $0x38] sm:$0xff] }
 0x259   :  { %v722_v32 = vsel %vm721_vm7, %v1698_v42, %v718_v24  ;;  %v725_v7 = vmul.f32 %v1702_v62, %v724_v2  ;;  %1707 = vtanh.f32 %v859_v17  ;;  %1254 = vmatpush.bf16.msrb.mxu1 %v1666_v59  ;;  %v1664_v2 = vld [vmem:[%s2456_s6 + $0x28] sm:$0xff] }
 0x25a   :  { %v828_v10 = vmul.f32 %v722_v32, %v2027_v9  ;;  %1554 = vmatmul.msk.bf16.gmra.mxu1 %vm244_vm2, %v888_v3  ;;  %1562 = vmatmul.msk.bf16.gmra.mxu0 %vm244_vm2, %v888_v3  ;;  %v622_v27 = vsel %vm244_vm2, %v580_v6, 0.0  ;;  %v1663_v6 = vld [vmem:[%s2456_s6 + $0x20] sm:$0xff]  ;;  %v1660_v17 = vld [vmem:[%s2456_s6 + $0x8] sm:$0xff] }
 0x25b   :  { %v726_v11 = vmul.f32 0.5, %v725_v7  ;;  %v609_v12 = vpop.xlane.xlu1 %608  ;;  %623 = vadd.xlane.f32.xlu2 %v622_v27  ;;  %v524_v47 = vpop.xlane.xlu0 %523  ;;  %v1662_v7 = vld [vmem:[%s2456_s6 + $0x18] sm:$0xff] }
 0x25c   :  { %v844_v14 = vmul.f32 %v828_v10, %v2113_v31  ;;  %v549_v54 = vmul.f32 %v1980_v38, %v524_v47 }
 0x25d   :  { %v727_v18 = vsub.f32 1.5, %v726_v11 }
 0x25e   :  { %v1706_v19 = vpop.eup %1705  ;;  %v2175_v9 = vsub.f32 %v2060_v36, %v549_v54  ;;  %v860_v20 = vadd.f32 %v844_v14, %v2120_v41 }
 0x25f   :  { %v728_v22 = vmul.f32 %v1702_v62, %v727_v18  ;;  %v734_v8 = vmul.f32 %v1706_v19, %v654_v63  ;;  %vm740_vm11 = vweird.f32 %v1706_v19  ;;  %v1708_v40 = vpop.eup %1707 }
 0x260   :  { %v581_v23 = vmul.f32 %v2175_v9, %v2175_v9  ;;  %1709 = vtanh.f32 %v860_v20  ;;  %vm741_vm13 = vmor %vm739_vm12, %vm740_vm11 }
 0x261   :  { %v732_v28 = vsel %vm731_vm10, %v1702_v62, %v728_v22  ;;  %v735_v30 = vmul.f32 %v1706_v19, %v734_v8  ;;  %v1665_v62 = vld [vmem:[%s2456_s6 + $0x30] sm:$0xff]  ;;  %v1659_v22 = vld [vmem:[%s2456_s6] sm:$0xff] }
 0x262   :  { %v625_v33 = vsel %vm244_vm2, %v581_v23, 0.0  ;;  %v829_v34 = vmul.f32 %v732_v28, %v2039_v16  ;;  %1255 = vmatpush.bf16.msrb.mxu1 %v1665_v62 }
 0x263   :  { %v736_v35 = vmul.f32 0.5, %v735_v30  ;;  %v527_v36 = vpop.xlane.xlu1 %526  ;;  %626 = vadd.xlane.f32.xlu0 %v625_v33 }
 0x264   :  { %v550_v37 = vmul.f32 %v1980_v38, %v527_v36  ;;  %v845_v60 = vmul.f32 %v829_v34, %v2113_v31  ;;  %v1674_v34 = vld [vmem:[%s2456_s6 + $0x78] sm:$0xff] }
 0x265   :  { %v737_v39 = vsub.f32 1.5, %v736_v35  ;;  %1303 = vmatpush.bf16.msrb.mxu3 %v1674_v34 }
 0x266   :  { %v2184_v42 = vsub.f32 %v2071_v43, %v550_v37  ;;  %v1710_v44 = vpop.eup %1709  ;;  %v861_v51 = vadd.f32 %v845_v60, %v2120_v41  ;;  %1256 = vmatpush.bf16.msrb.mxu1 %v1664_v2 }
 0x267   :  { %v738_v45 = vmul.f32 %v1706_v19, %v737_v39  ;;  %v889_v46 = vpack.c.bf16 %v1710_v44, %v1708_v40 }
 0x268   :  { %v582_v16 = vmul.f32 %v2184_v42, %v2184_v42  ;;  %1711 = vtanh.f32 %v861_v51 }
 0x269   :  { %v742_v49 = vsel %vm741_vm13, %v1706_v19, %v738_v45  ;;  %1555 = vmatmul.msk.bf16.vlgmr.msra.gmra.mxu3 %vm244_vm2, %v889_v46 }
 0x26a   :  { %v830_v50 = vmul.f32 %v742_v49, %v2051_v21  ;;  %1563 = vmatmul.msk.bf16.gmra.mxu0 %vm244_vm2, %v889_v46  ;;  %v628_v43 = vsel %vm244_vm2, %v582_v16, 0.0  ;;  %v639_v21 = vmul.f32 %v609_v12, %v1980_v38  ;;  %1257 = vmatpush.bf16.msrb.mxu1 %v1663_v6  ;;  %v1661_v12 = vld [vmem:[%s2456_s6 + $0x10] sm:$0xff]  ;;  %v2240_v16 = vld [vmem:[%s2454_s7 + $0x4] ss:$8 sm:$0x3] }
 0x26b   :  { %629 = vadd.xlane.f32.xlu1 %v628_v43 }
 0x26c   :  { %v846_v4 = vmul.f32 %v830_v50, %v2113_v31  ;;  %v655_v56 = vadd.f32 1e-05, %v639_v21 }
 0x26e   :  { %v862_v52 = vadd.f32 %v846_v4, %v2120_v41  ;;  %v1712_v53 = vpop.eup %1711  ;;  %vm749_vm15 = vweird.f32 %v655_v56  ;;  %1258 = vmatpush.bf16.msrb.mxu1 %v1662_v7 }
 0x270   :  { %1713 = vtanh.f32 %v862_v52  ;;  %v2244_v52 = vperm.slane %v2240_v16, 0 }
 0x271   :  { %1715 = vrsqrt.f32 %v655_v56 }
 0x272   :  { %1259 = vmatpush.bf16.msrb.mxu1 %v1661_v12 }
 0x276   :  { %v1714_v15 = vpop.eup %1713  ;;  %1260 = vmatpush.bf16.msrb.mxu1 %v1660_v17 }
 0x277   :  { %v890_v55 = vpack.c.bf16 %v1714_v15, %v1712_v53  ;;  %v1716_v48 = vpop.eup %1715  ;;  %v1673_v53 = vld [vmem:[%s2456_s6 + $0x70] sm:$0xff] }
 0x278   :  { %v744_v58 = vmul.f32 %v1716_v48, %v655_v56  ;;  %vm750_vm14 = vweird.f32 %v1716_v48  ;;  %1304 = vmatpush.bf16.msrb.mxu3 %v1673_v53 }
 0x279   :  { %1556 = vmatmul.msk.bf16.gmra.mxu3 %vm244_vm2, %v890_v55  ;;  %vm751_vm0 = vmor %vm749_vm15, %vm750_vm14 }
 0x27a   :  { %1564 = vmatmul.msk.bf16.gmra.mxu0 %vm244_vm2, %v890_v55  ;;  %v745_v61 = vmul.f32 %v1716_v48, %v744_v58  ;;  %1261 = vmatpush.bf16.msrb.mxu1 %v1659_v22 }
 0x27c   :  { %v746_v1 = vmul.f32 0.5, %v745_v61 }
 0x27e   :  { %v747_v3 = vsub.f32 1.5, %v746_v1 }
 0x280   :  { %v748_v32 = vmul.f32 %v1716_v48, %v747_v3  ;;  %v1672_v3 = vld [vmem:[%s2456_s6 + $0x68] sm:$0xff] }
 0x281   :  { %1305 = vmatpush.bf16.msrb.mxu3 %v1672_v3 }
 0x282   :  { %v752_v11 = vsel %vm751_vm0, %v1716_v48, %v748_v32 }
 0x283   :  { %v831_v14 = vmul.f32 %v752_v11, %v2063_v25 }
 0x285   :  { %v847_v19 = vmul.f32 %v831_v14, %v2113_v31 }
 0x287   :  { %v863_v23 = vadd.f32 %v847_v19, %v2120_v41 }
 0x29e   :  { %v612_v63 = vpop.xlane.xlu2 %611 }
 0x29f   :  { %v640_v24 = vmul.f32 %v612_v63, %v1980_v38 }
 0x2a1   :  { %v656_v5 = vadd.f32 1e-05, %v640_v24 }
 0x2a3   :  { %1717 = vrsqrt.f32 %v656_v5  ;;  %vm759_vm3 = vweird.f32 %v656_v5 }
 0x2a4   :  { %1719 = vtanh.f32 %v863_v23  ;;  %v1671_v23 = vld [vmem:[%s2456_s6 + $0x60] sm:$0xff] }
 0x2a5   :  { %1306 = vmatpush.bf16.msrb.mxu3 %v1671_v23 }
 0x2a9   :  { %v1718_v10 = vpop.eup %1717 }
 0x2aa   :  { %v754_v27 = vmul.f32 %v1718_v10, %v656_v5  ;;  %vm760_vm1 = vweird.f32 %v1718_v10  ;;  %v1720_v37 = vpop.eup %1719 }
 0x2ab   :  { %vm761_vm4 = vmor %vm759_vm3, %vm760_vm1 }
 0x2ac   :  { %v755_v47 = vmul.f32 %v1718_v10, %v754_v27 }
 0x2ae   :  { %v756_v54 = vmul.f32 0.5, %v755_v47 }
 0x2b0   :  { %v757_v18 = vsub.f32 1.5, %v756_v54 }
 0x2b2   :  { %v758_v20 = vmul.f32 %v1718_v10, %v757_v18 }
 0x2b4   :  { %v762_v8 = vsel %vm761_vm4, %v1718_v10, %v758_v20 }
 0x2b5   :  { %v832_v25 = vmul.f32 %v762_v8, %v2103_v26 }
 0x2b6   :  { %v615_v30 = vpop.xlane.xlu2 %614 }
 0x2b7   :  { %v848_v28 = vmul.f32 %v832_v25, %v2113_v31  ;;  %v641_v33 = vmul.f32 %v615_v30, %v1980_v38 }
 0x2b9   :  { %v864_v35 = vadd.f32 %v848_v28, %v2120_v41  ;;  %v657_v36 = vadd.f32 1e-05, %v641_v33 }
 0x2bb   :  { %1721 = vtanh.f32 %v864_v35  ;;  %vm769_vm6 = vweird.f32 %v657_v36 }
 0x2bc   :  { %1723 = vrsqrt.f32 %v657_v36 }
 0x2be   :  { %v618_v26 = vpop.xlane.xlu0 %617 }
 0x2bf   :  { %v642_v39 = vmul.f32 %v618_v26, %v1980_v38 }
 0x2c1   :  { %v1722_v40 = vpop.eup %1721  ;;  %v658_v60 = vadd.f32 1e-05, %v642_v39 }
 0x2c2   :  { %v1724_v44 = vpop.eup %1723  ;;  %v891_v45 = vpack.c.bf16 %v1722_v40, %v1720_v37 }
 0x2c3   :  { %v764_v46 = vmul.f32 %v1724_v44, %v657_v36  ;;  %1725 = vrsqrt.f32 %v658_v60  ;;  %vm770_vm5 = vweird.f32 %v1724_v44  ;;  %vm779_vm9 = vweird.f32 %v658_v60 }
 0x2c4   :  { %1557 = vmatmul.msk.bf16.gmra.mxu3 %vm244_vm2, %v891_v45  ;;  %1565 = vmatmul.msk.bf16.gmra.mxu0 %vm244_vm2, %v891_v45  ;;  %vm771_vm7 = vmor %vm769_vm6, %vm770_vm5 }
 0x2c5   :  { %v765_v49 = vmul.f32 %v1724_v44, %v764_v46 }
 0x2c6   :  { %v621_v50 = vpop.xlane.xlu1 %620  ;;  %v957_v43 = vpop.f32.mrf.mxu1 }
 0x2c7   :  { %v766_v51 = vmul.f32 0.5, %v765_v49  ;;  %v643_v4 = vmul.f32 %v621_v50, %v1980_v38  ;;  %v958_v58 = vadd.f32 %v957_v43, %v2244_v52 }
 0x2c9   :  { %v767_v15 = vsub.f32 1.5, %v766_v51  ;;  %v659_v55 = vadd.f32 1e-05, %v643_v4  ;;  %v1726_v21 = vpop.eup %1725  ;;  %v1046_v24 = vmul.f32 0.01, %v958_v58 }
 0x2ca   :  { %v774_v48 = vmul.f32 %v1726_v21, %v658_v60  ;;  %vm780_vm8 = vweird.f32 %v1726_v21 }
 0x2cb   :  { %v768_v56 = vmul.f32 %v1724_v44, %v767_v15  ;;  %1727 = vrsqrt.f32 %v659_v55  ;;  %v1078_v47 = vmax.f32 %v958_v58, %v1046_v24  ;;  %vm781_vm10 = vmor %vm779_vm9, %vm780_vm8  ;;  %vm789_vm12 = vweird.f32 %v659_v55 }
 0x2cc   :  { %v775_v61 = vmul.f32 %v1726_v21, %v774_v48  ;;  %vm1403_vm8 = vcmask 363520  }
 0x2cd   :  { %v772_v59 = vsel %vm771_vm7, %v1724_v44, %v768_v56 }
 0x2ce   :  { %v959_v62 = vpop.f32.mrf.mxu1  ;;  %v624_v63 = vpop.xlane.xlu2 %623  ;;  %v776_v1 = vmul.f32 0.5, %v775_v61  ;;  %v833_v6 = vmul.f32 %v772_v59, %v2129_v57 }
 0x2cf   :  { %v960_v2 = vadd.f32 %v959_v62, %v2244_v52  ;;  %v644_v5 = vmul.f32 %v624_v63, %v1980_v38 }
 0x2d0   :  { %v777_v7 = vsub.f32 1.5, %v776_v1  ;;  %v849_v54 = vmul.f32 %v833_v6, %v2113_v31  ;;  %v1669_v1 = vld [vmem:[%s2456_s6 + $0x50] sm:$0xff] }
 0x2d1   :  { %v1728_v32 = vpop.eup %1727  ;;  %v1048_v10 = vmul.f32 0.01, %v960_v2  ;;  %v660_v27 = vadd.f32 1e-05, %v644_v5 }
 0x2d2   :  { %v784_v11 = vmul.f32 %v1728_v32, %v659_v55  ;;  %v778_v12 = vmul.f32 %v1726_v21, %v777_v7  ;;  %vm790_vm11 = vweird.f32 %v1728_v32  ;;  %v865_v33 = vadd.f32 %v849_v54, %v2120_v41  ;;  %v1668_v7 = vld [vmem:[%s2456_s6 + $0x48] sm:$0xff] }
 0x2d3   :  { %v1080_v14 = vmax.f32 %v960_v2, %v1048_v10  ;;  %1729 = vrsqrt.f32 %v660_v27  ;;  %vm791_vm13 = vmor %vm789_vm12, %vm790_vm11  ;;  %vm799_vm15 = vweird.f32 %v660_v27 }
 0x2d4   :  { %v785_v17 = vmul.f32 %v1728_v32, %v784_v11  ;;  %v782_v18 = vsel %vm781_vm10, %v1726_v21, %v778_v12 }
 0x2d5   :  { %v1110_v19 = vpack.c.bf16 %v1080_v14, %v1078_v47  ;;  %v834_v57 = vmul.f32 %v782_v18, %v2138_v13  ;;  %v1670_v13 = vld [vmem:[%s2456_s6 + $0x58] sm:$0xff]  ;;  %v1667_v18 = vld [vmem:[%s2456_s6 + $0x40] sm:$0xff] }
 0x2d6   :  { %v786_v20 = vmul.f32 0.5, %v785_v17  ;;  %v627_v22 = vpop.xlane.xlu0 %626  ;;  %1307 = vmatpush.bf16.msrb.mxu3 %v1670_v13 }
 0x2d7   :  { %v962_v8 = vpop.f32.mrf.mxu1  ;;  %v645_v25 = vmul.f32 %v627_v22, %v1980_v38  ;;  %1262 = vmatmul.bf16.vlgmr.msrb.gmra.mxu1 %v1110_v19  ;;  %v850_v28 = vmul.f32 %v834_v57, %v2113_v31  ;;  %v1006_v19 = vpop.f32.mrf.mxu0 }
 0x2d8   :  { %v787_v30 = vsub.f32 1.5, %v786_v20  ;;  %v963_v37 = vadd.f32 %v962_v8, %v2244_v52 }
 0x2d9   :  { %v1730_v34 = vpop.eup %1729  ;;  %v661_v35 = vadd.f32 1e-05, %v645_v25  ;;  %v866_v39 = vadd.f32 %v850_v28, %v2120_v41 }
 0x2da   :  { %v788_v36 = vmul.f32 %v1728_v32, %v787_v30  ;;  %v794_v26 = vmul.f32 %v1730_v34, %v660_v27  ;;  %v1050_v49 = vmul.f32 0.01, %v963_v37  ;;  %vm800_vm14 = vweird.f32 %v1730_v34  ;;  %1308 = vmatpush.bf16.msrb.mxu3 %v1669_v1 }
 0x2db   :  { %1731 = vrsqrt.f32 %v661_v35  ;;  %vm801_vm0 = vmor %vm799_vm15, %vm800_vm14  ;;  %vm809_vm3 = vweird.f32 %v661_v35 }
 0x2dc   :  { %v792_v40 = vsel %vm791_vm13, %v1728_v32, %v788_v36  ;;  %v795_v44 = vmul.f32 %v1730_v34, %v794_v26  ;;  %1733 = vtanh.f32 %v865_v33  ;;  %v1082_v59 = vmax.f32 %v963_v37, %v1050_v49 }
 0x2dd   :  { %1735 = vtanh.f32 %v866_v39  ;;  %v835_v60 = vmul.f32 %v792_v40, %v2152_v29 }
 0x2de   :  { %v796_v45 = vmul.f32 0.5, %v795_v44  ;;  %v630_v46 = vpop.xlane.xlu1 %629  ;;  %1309 = vmatpush.bf16.msrb.mxu3 %v1668_v7 }
 0x2df   :  { %v646_v50 = vmul.f32 %v630_v46, %v1980_v38  ;;  %v964_v43 = vpop.f32.mrf.mxu1  ;;  %v851_v21 = vmul.f32 %v835_v60, %v2113_v31  ;;  %v1008_v37 = vpop.f32.mrf.mxu0 }
 0x2e0   :  { %v797_v51 = vsub.f32 1.5, %v796_v45  ;;  %v965_v4 = vadd.f32 %v964_v43, %v2244_v52 }
 0x2e1   :  { %v1732_v53 = vpop.eup %1731  ;;  %v662_v15 = vadd.f32 1e-05, %v646_v50  ;;  %v867_v3 = vadd.f32 %v851_v21, %v2120_v41 }
 0x2e2   :  { %v1734_v55 = vpop.eup %1733  ;;  %v798_v56 = vmul.f32 %v1730_v34, %v797_v51  ;;  %v804_v48 = vmul.f32 %v1732_v53, %v661_v35  ;;  %v1052_v58 = vmul.f32 0.01, %v965_v4  ;;  %vm810_vm1 = vweird.f32 %v1732_v53  ;;  %1310 = vmatpush.bf16.msrb.mxu3 %v1667_v18 }
 0x2e3   :  { %v1736_v29 = vpop.eup %1735  ;;  %1737 = vrsqrt.f32 %v662_v15  ;;  %vm811_vm4 = vmor %vm809_vm3, %vm810_vm1  ;;  %vm819_vm6 = vweird.f32 %v662_v15 }
 0x2e4   :  { %v802_v61 = vsel %vm801_vm0, %v1730_v34, %v798_v56  ;;  %v805_v38 = vmul.f32 %v1732_v53, %v804_v48  ;;  %v1084_v62 = vmax.f32 %v965_v4, %v1052_v58  ;;  %v892_v63 = vpack.c.bf16 %v1736_v29, %v1734_v55 }
 0x2e5   :  { %v836_v24 = vmul.f32 %v802_v61, %v2162_v0  ;;  %1739 = vtanh.f32 %v867_v3 }
 0x2e6   :  { %v806_v2 = vmul.f32 0.5, %v805_v38  ;;  %1558 = vmatmul.msk.bf16.gmra.mxu3 %vm244_vm2, %v892_v63  ;;  %1566 = vmatmul.msk.bf16.gmra.mxu0 %vm244_vm2, %v892_v63  ;;  %v1112_v5 = vpack.c.bf16 %v1084_v62, %v1082_v59 }
 0x2e7   :  { %v852_v6 = vmul.f32 %v836_v24, %v2113_v31  ;;  %v1011_v43 = vpop.f32.mrf.mxu0 }
 0x2e8   :  { %v807_v32 = vsub.f32 1.5, %v806_v2  ;;  %1267 = vmatmul.bf16.gmra.mxu1 %v1112_v5 }
 0x2e9   :  { %v1738_v10 = vpop.eup %1737  ;;  %v868_v0 = vadd.f32 %v852_v6, %v2120_v41 }
 0x2ea   :  { %v808_v27 = vmul.f32 %v1732_v53, %v807_v32  ;;  %v814_v11 = vmul.f32 %v1738_v10, %v662_v15  ;;  %vm820_vm5 = vweird.f32 %v1738_v10 }
 0x2eb   :  { %1741 = vtanh.f32 %v868_v0  ;;  %v1740_v57 = vpop.eup %1739  ;;  %vm821_vm7 = vmor %vm819_vm6, %vm820_vm5 }
 0x2ec   :  { %v812_v12 = vsel %vm811_vm4, %v1732_v53, %v808_v27  ;;  %v815_v47 = vmul.f32 %v1738_v10, %v814_v11  ;;  %v967_v14 = vpop.f32.mrf.mxu3 }
 0x2ed   :  { %v837_v54 = vmul.f32 %v812_v12, %v2175_v9  ;;  %v968_v23 = vadd.f32 %v967_v14, %v2244_v52 }
 0x2ee   :  { %v816_v17 = vmul.f32 0.5, %v815_v47 }
 0x2ef   :  { %v853_v8 = vmul.f32 %v837_v54, %v2113_v31  ;;  %v1054_v34 = vmul.f32 0.01, %v968_v23  ;;  %v1013_v29 = vpop.f32.mrf.mxu0 }
 0x2f0   :  { %v817_v20 = vsub.f32 1.5, %v816_v17 }
 0x2f1   :  { %v1742_v22 = vpop.eup %1741  ;;  %v869_v13 = vadd.f32 %v853_v8, %v2120_v41  ;;  %v1086_v40 = vmax.f32 %v968_v23, %v1054_v34 }
 0x2f2   :  { %v818_v25 = vmul.f32 %v1738_v10, %v817_v20  ;;  %v893_v28 = vpack.c.bf16 %v1742_v22, %v1740_v57 }
 0x2f3   :  { %1743 = vtanh.f32 %v869_v13 }
 0x2f4   :  { %v822_v9 = vsel %vm821_vm7, %v1738_v10, %v818_v25  ;;  %v969_v33 = vpop.f32.mrf.mxu3 }
 0x2f5   :  { %v838_v30 = vmul.f32 %v822_v9, %v2184_v42  ;;  %v970_v35 = vadd.f32 %v969_v33, %v2244_v52 }
 0x2f6   :  { %1559 = vmatmul.msk.bf16.gmra.mxu3 %vm244_vm2, %v893_v28  ;;  %1567 = vmatmul.msk.bf16.gmra.mxu0 %vm244_vm2, %v893_v28 }
 0x2f7   :  { %v854_v36 = vmul.f32 %v838_v30, %v2113_v31  ;;  %v1056_v26 = vmul.f32 0.01, %v970_v35  ;;  %v2300_v31 = vperm.slane %v2240_v16, 1  ;;  %v1016_v62 = vpop.f32.mrf.mxu0 }
 0x2f9   :  { %v870_v39 = vadd.f32 %v854_v36, %v2120_v41  ;;  %v1088_v44 = vmax.f32 %v970_v35, %v1056_v26  ;;  %v1744_v45 = vpop.eup %1743  ;;  %v1009_v53 = vadd.f32 %v1008_v37, %v2300_v31  ;;  %v1007_v55 = vadd.f32 %v1006_v19, %v2300_v31 }
 0x2fa   :  { %v1014_v63 = vadd.f32 %v1013_v29, %v2300_v31  ;;  %v1012_v1 = vadd.f32 %v1011_v43, %v2300_v31  ;;  %v1017_v10 = vadd.f32 %v1016_v62, %v2300_v31 }
 0x2fb   :  { %1745 = vtanh.f32 %v870_v39  ;;  %v1114_v42 = vpack.c.bf16 %v1088_v44, %v1086_v40  ;;  %v1049_v48 = vmul.f32 0.01, %v1009_v53  ;;  %v1047_v59 = vmul.f32 0.01, %v1007_v55 }
 0x2fc   :  { %v972_v60 = vpop.f32.mrf.mxu3  ;;  %v1053_v24 = vmul.f32 0.01, %v1014_v63  ;;  %v1051_v2 = vmul.f32 0.01, %v1012_v1  ;;  %v1055_v11 = vmul.f32 0.01, %v1017_v10 }
 0x2fd   :  { %1272 = vmatmul.bf16.gmra.mxu1 %v1114_v42  ;;  %v973_v49 = vadd.f32 %v972_v60, %v2244_v52  ;;  %v1081_v16 = vmax.f32 %v1009_v53, %v1049_v48  ;;  %v1079_v61 = vmax.f32 %v1007_v55, %v1047_v59 }
 0x2fe   :  { %v1085_v5 = vmax.f32 %v1014_v63, %v1053_v24  ;;  %v1083_v6 = vmax.f32 %v1012_v1, %v1051_v2  ;;  %v1087_v47 = vmax.f32 %v1017_v10, %v1055_v11 }
 0x2ff   :  { %v1058_v4 = vmul.f32 0.01, %v973_v49  ;;  %v1111_v38 = vpack.c.bf16 %v1081_v16, %v1079_v61  ;;  %v1018_v3 = vpop.f32.mrf.mxu0 }
 0x300   :  { %v1113_v32 = vpack.c.bf16 %v1085_v5, %v1083_v6  ;;  %v1019_v7 = vadd.f32 %v1018_v3, %v2300_v31 }
 0x301   :  { %v1746_v46 = vpop.eup %1745  ;;  %v1090_v21 = vmax.f32 %v973_v49, %v1058_v4 }
 0x302   :  { %v894_v50 = vpack.c.bf16 %v1746_v46, %v1744_v45  ;;  %v1057_v27 = vmul.f32 0.01, %v1019_v7 }
 0x304   :  { %v974_v51 = vpop.f32.mrf.mxu3  ;;  %v1089_v12 = vmax.f32 %v1019_v7, %v1057_v27 }
 0x305   :  { %v975_v41 = vadd.f32 %v974_v51, %v2244_v52 }
 0x306   :  { %1560 = vmatmul.msk.bf16.gmra.mxu3 %vm244_vm2, %v894_v50  ;;  %1568 = vmatmul.msk.bf16.gmra.mxu0 %vm244_vm2, %v894_v50  ;;  %v1115_v14 = vpack.c.bf16 %v1089_v12, %v1087_v47 }
 0x307   :  { %v1060_v15 = vmul.f32 0.01, %v975_v41  ;;  %v1021_v0 = vpop.f32.mrf.mxu0 }
 0x308   :  { %v1022_v18 = vadd.f32 %v1021_v0, %v2300_v31 }
 0x309   :  { %v1092_v56 = vmax.f32 %v975_v41, %v1060_v15 }
 0x30a   :  { %v1059_v57 = vmul.f32 0.01, %v1022_v18 }
 0x30b   :  { %v1116_v58 = vpack.c.bf16 %v1092_v56, %v1090_v21 }
 0x30c   :  { %v1091_v8 = vmax.f32 %v1022_v18, %v1059_v57 }
 0x30d   :  { %1277 = vmatmul.bf16.gmra.mxu1 %v1116_v58 }
 0x30f   :  { %v1023_v54 = vpop.f32.mrf.mxu0 }
 0x310   :  { %v1024_v17 = vadd.f32 %v1023_v54, %v2300_v31 }
 0x312   :  { %v1061_v19 = vmul.f32 0.01, %v1024_v17 }
 0x314   :  { %v1093_v20 = vmax.f32 %v1024_v17, %v1061_v19 }
 0x316   :  { %1311 = vmatmul.bf16.vlgmr.msrb.gmra.mxu3 %v1111_v38  ;;  %v1117_v25 = vpack.c.bf16 %v1093_v20, %v1091_v8 }
 0x326   :  { %1316 = vmatmul.bf16.gmra.mxu3 %v1113_v32 }
 0x336   :  { %1321 = vmatmul.bf16.gmra.mxu3 %v1115_v14 }
 0x341   :  { %v1026_v22 = vpop.f32.mrf.mxu0 }
 0x342   :  { %v1027_v9 = vadd.f32 %v1026_v22, %v2300_v31 }
 0x344   :  { %v1063_v35 = vmul.f32 0.01, %v1027_v9 }
 0x346   :  { %1326 = vmatmul.bf16.gmra.mxu3 %v1117_v25  ;;  %v1095_v39 = vmax.f32 %v1027_v9, %v1063_v35 }
 0x347   :  { %v977_v23 = vpop.f32.mrf.mxu3 }
 0x348   :  { %v978_v33 = vadd.f32 %v977_v23, %v2244_v52 }
 0x349   :  { %v1028_v28 = vpop.f32.mrf.mxu0 }
 0x34a   :  { %v1029_v30 = vadd.f32 %v1028_v28, %v2300_v31  ;;  %v1062_v36 = vmul.f32 0.01, %v978_v33 }
 0x34c   :  { %v1065_v34 = vmul.f32 0.01, %v1029_v30  ;;  %v1094_v44 = vmax.f32 %v978_v33, %v1062_v36  ;;  %v2332_v36 = vld [vmem:[%s2454_s7 + $0x5] ss:$0 sm:$0xff] }
 0x34e   :  { %v1097_v26 = vmax.f32 %v1029_v30, %v1065_v34 }
 0x34f   :  { %v979_v13 = vpop.f32.mrf.mxu3 }
 0x350   :  { %v980_v37 = vadd.f32 %v979_v13, %v2244_v52  ;;  %v1119_v60 = vpack.c.bf16 %v1097_v26, %v1095_v39  ;;  %v1352_v39 = vlaneseq }
 0x352   :  { %v1064_v40 = vmul.f32 0.01, %v980_v37 }
 0x354   :  { %v1096_v42 = vmax.f32 %v980_v37, %v1064_v40  ;;  %v1263_v18 = vpop.f32.mrf.mxu1 }
 0x355   :  { %v1264_v37 = vadd.f32 %v1263_v18, %v2332_v36 }
 0x356   :  { %1331 = vmatmul.bf16.gmra.mxu3 %v1119_v60  ;;  %v1118_v45 = vpack.c.bf16 %v1096_v42, %v1094_v44  ;;  %v2335_v60 = vand.u32 127, %v1352_v39 }
 0x358   :  { %1282 = vmatmul.bf16.gmra.mxu1 %v1118_v45  ;;  %vm1354_vm2 = vcmp.lt.s32.totalorder %v2335_v60, 32 }
 0x35c   :  { %v1265_v35 = vpop.f32.mrf.mxu1 }
 0x35d   :  { %v1266_v45 = vadd.f32 %v1265_v35, %v2332_v36 }
 0x363   :  { %v1031_v46 = vpop.f32.mrf.mxu0 }
 0x364   :  { %v1032_v49 = vadd.f32 %v1031_v46, %v2300_v31 }
 0x366   :  { %v1067_v51 = vmul.f32 0.01, %v1032_v49 }
 0x368   :  { %v1099_v15 = vmax.f32 %v1032_v49, %v1067_v51 }
 0x369   :  { %v982_v50 = vpop.f32.mrf.mxu3 }
 0x36a   :  { %v983_v41 = vadd.f32 %v982_v50, %v2244_v52 }
 0x36b   :  { %v1033_v43 = vpop.f32.mrf.mxu0 }
 0x36c   :  { %v1034_v4 = vadd.f32 %v1033_v43, %v2300_v31  ;;  %v1066_v56 = vmul.f32 0.01, %v983_v41 }
 0x36e   :  { %v1069_v53 = vmul.f32 0.01, %v1034_v4  ;;  %v1098_v16 = vmax.f32 %v983_v41, %v1066_v56 }
 0x370   :  { %v1101_v55 = vmax.f32 %v1034_v4, %v1069_v53 }
 0x371   :  { %v984_v21 = vpop.f32.mrf.mxu3 }
 0x372   :  { %v985_v48 = vadd.f32 %v984_v21, %v2244_v52  ;;  %v1121_v58 = vpack.c.bf16 %v1101_v55, %v1099_v15 }
 0x373   :  { %v1036_v29 = vpop.f32.mrf.mxu0 }
 0x374   :  { %v1068_v59 = vmul.f32 0.01, %v985_v48  ;;  %1336 = vmatmul.bf16.gmra.mxu3 %v1121_v58  ;;  %v1037_v38 = vadd.f32 %v1036_v29, %v2300_v31 }
 0x376   :  { %v1100_v61 = vmax.f32 %v985_v48, %v1068_v59  ;;  %v1071_v24 = vmul.f32 0.01, %v1037_v38 }
 0x378   :  { %v1120_v62 = vpack.c.bf16 %v1100_v61, %v1098_v16  ;;  %v1103_v6 = vmax.f32 %v1037_v38, %v1071_v24 }
 0x379   :  { %v987_v63 = vpop.f32.mrf.mxu3 }
 0x37a   :  { %1287 = vmatmul.bf16.gmra.mxu1 %v1120_v62  ;;  %v988_v5 = vadd.f32 %v987_v63, %v2244_v52 }
 0x37b   :  { %v1038_v1 = vpop.f32.mrf.mxu0 }
 0x37c   :  { %v1039_v2 = vadd.f32 %v1038_v1, %v2300_v31  ;;  %v1070_v10 = vmul.f32 0.01, %v988_v5 }
 0x37e   :  { %v1073_v3 = vmul.f32 0.01, %v1039_v2  ;;  %v1102_v47 = vmax.f32 %v988_v5, %v1070_v10 }
 0x380   :  { %v1105_v32 = vmax.f32 %v1039_v2, %v1073_v3 }
 0x381   :  { %v989_v7 = vpop.f32.mrf.mxu3 }
 0x382   :  { %v990_v0 = vadd.f32 %v989_v7, %v2244_v52  ;;  %v1123_v27 = vpack.c.bf16 %v1105_v32, %v1103_v6 }
 0x383   :  { %v1041_v11 = vpop.f32.mrf.mxu0 }
 0x384   :  { %v1072_v12 = vmul.f32 0.01, %v990_v0  ;;  %1341 = vmatmul.bf16.gmra.mxu3 %v1123_v27  ;;  %v1042_v54 = vadd.f32 %v1041_v11, %v2300_v31 }
 0x386   :  { %v1104_v14 = vmax.f32 %v990_v0, %v1072_v12  ;;  %v1075_v20 = vmul.f32 0.01, %v1042_v54 }
 0x388   :  { %v1122_v17 = vpack.c.bf16 %v1104_v14, %v1102_v47  ;;  %v1107_v23 = vmax.f32 %v1042_v54, %v1075_v20 }
 0x389   :  { %v992_v19 = vpop.f32.mrf.mxu3 }
 0x38a   :  { %1292 = vmatmul.bf16.gmra.mxu1 %v1122_v17  ;;  %v993_v8 = vadd.f32 %v992_v19, %v2244_v52 }
 0x38b   :  { %v1043_v57 = vpop.f32.mrf.mxu0 }
 0x38c   :  { %v1044_v22 = vadd.f32 %v1043_v57, %v2300_v31  ;;  %v1074_v30 = vmul.f32 0.01, %v993_v8 }
 0x38e   :  { %v1077_v25 = vmul.f32 0.01, %v1044_v22  ;;  %v1106_v26 = vmax.f32 %v993_v8, %v1074_v30 }
 0x390   :  { %v1109_v28 = vmax.f32 %v1044_v22, %v1077_v25 }
 0x391   :  { %v994_v9 = vpop.f32.mrf.mxu3 }
 0x392   :  { %v995_v33 = vadd.f32 %v994_v9, %v2244_v52  ;;  %v1125_v34 = vpack.c.bf16 %v1109_v28, %v1107_v23  ;;  %v1268_v52 = vpop.f32.mrf.mxu1 }
 0x393   :  { %v1269_v41 = vadd.f32 %v1268_v52, %v2332_v36 }
 0x394   :  { %v1076_v13 = vmul.f32 0.01, %v995_v33  ;;  %1346 = vmatmul.bf16.gmra.mxu3 %v1125_v34 }
 0x396   :  { %v1108_v31 = vmax.f32 %v995_v33, %v1076_v13 }
 0x398   :  { %v1124_v40 = vpack.c.bf16 %v1108_v31, %v1106_v26 }
 0x399   :  { %v1312_v44 = vpop.f32.mrf.mxu3 }
 0x39a   :  { %v1313_v42 = vadd.f32 %v1312_v44, %v1264_v37  ;;  %1297 = vmatmul.bf16.gmra.mxu1 %v1124_v40  ;;  %v1270_v4 = vpop.f32.mrf.mxu1 }
 0x39b   :  { %v1271_v58 = vadd.f32 %v1270_v4, %v2332_v36 }
 0x39c   :  { %1747 = vtanh.f32 %v1313_v42 }
 0x3a1   :  { %v1314_v46 = vpop.f32.mrf.mxu3 }
 0x3a2   :  { %v1748_v49 = vpop.eup %1747  ;;  %v1315_v50 = vadd.f32 %v1314_v46, %v1266_v45  ;;  %v1273_v48 = vpop.f32.mrf.mxu1 }
 0x3a3   :  { %v1371_v43 = vsel %vm1354_vm2, %v1748_v49, %v1313_v42  ;;  %v1274_v62 = vadd.f32 %v1273_v48, %v2332_v36 }
 0x3a4   :  { %v1387_v51 = vpack.c.bf16 %v1371_v43, %v1371_v43  ;;  %1749 = vtanh.f32 %v1315_v50 }
 0x3a6   :  { %1404 = vst.msk [vmem:[%s2457_s8] sm:$0xf] %vm1403_vm8, %v1387_v51 }
 0x3a9   :  { %v1317_v53 = vpop.f32.mrf.mxu3 }
 0x3aa   :  { %v1750_v15 = vpop.eup %1749  ;;  %v1318_v55 = vadd.f32 %v1317_v53, %v1269_v41  ;;  %v1275_v63 = vpop.f32.mrf.mxu1 }
 0x3ab   :  { %v1372_v21 = vsel %vm1354_vm2, %v1750_v15, %v1315_v50  ;;  %v1276_v6 = vadd.f32 %v1275_v63, %v2332_v36 }
 0x3ac   :  { %v1388_v56 = vpack.c.bf16 %v1372_v21, %v1372_v21  ;;  %1751 = vtanh.f32 %v1318_v55 }
 0x3ae   :  { %1405 = vst.msk [vmem:[%s2457_s8 + $0x4] sm:$0xf] %vm1403_vm8, %v1388_v56 }
 0x3b1   :  { %v1319_v29 = vpop.f32.mrf.mxu3 }
 0x3b2   :  { %v1752_v59 = vpop.eup %1751  ;;  %v1320_v16 = vadd.f32 %v1319_v29, %v1271_v58  ;;  %v1278_v0 = vpop.f32.mrf.mxu1 }
 0x3b3   :  { %v1373_v61 = vsel %vm1354_vm2, %v1752_v59, %v1318_v55  ;;  %v1279_v12 = vadd.f32 %v1278_v0, %v2332_v36 }
 0x3b4   :  { %v1389_v38 = vpack.c.bf16 %v1373_v61, %v1373_v61  ;;  %1753 = vtanh.f32 %v1320_v16 }
 0x3b6   :  { %1406 = vst.msk [vmem:[%s2457_s8 + $0x8] sm:$0xf] %vm1403_vm8, %v1389_v38 }
 0x3b9   :  { %v1322_v1 = vpop.f32.mrf.mxu3 }
 0x3ba   :  { %v1754_v24 = vpop.eup %1753  ;;  %v1323_v2 = vadd.f32 %v1322_v1, %v1274_v62  ;;  %v1280_v19 = vpop.f32.mrf.mxu1 }
 0x3bb   :  { %v1374_v5 = vsel %vm1354_vm2, %v1754_v24, %v1320_v16  ;;  %v1281_v57 = vadd.f32 %v1280_v19, %v2332_v36 }
 0x3bc   :  { %v1390_v3 = vpack.c.bf16 %v1374_v5, %v1374_v5  ;;  %1755 = vtanh.f32 %v1323_v2 }
 0x3be   :  { %1407 = vst.msk [vmem:[%s2457_s8 + $0xc] sm:$0xf] %vm1403_vm8, %v1390_v3 }
 0x3c1   :  { %v1324_v32 = vpop.f32.mrf.mxu3 }
 0x3c2   :  { %v1756_v7 = vpop.eup %1755  ;;  %v1325_v10 = vadd.f32 %v1324_v32, %v1276_v6 }
 0x3c3   :  { %v1375_v27 = vsel %vm1354_vm2, %v1756_v7, %v1323_v2 }
 0x3c4   :  { %v1391_v11 = vpack.c.bf16 %v1375_v27, %v1375_v27  ;;  %1757 = vtanh.f32 %v1325_v10 }
 0x3c6   :  { %1408 = vst.msk [vmem:[%s2457_s8 + $0x10] sm:$0xf] %vm1403_vm8, %v1391_v11 }
 0x3c9   :  { %v1327_v47 = vpop.f32.mrf.mxu3 }
 0x3ca   :  { %v1758_v14 = vpop.eup %1757  ;;  %v1328_v54 = vadd.f32 %v1327_v47, %v1279_v12 }
 0x3cb   :  { %v1376_v17 = vsel %vm1354_vm2, %v1758_v14, %v1325_v10 }
 0x3cc   :  { %v1392_v18 = vpack.c.bf16 %v1376_v17, %v1376_v17  ;;  %1759 = vtanh.f32 %v1328_v54 }
 0x3ce   :  { %1409 = vst.msk [vmem:[%s2457_s8 + $0x14] sm:$0xf] %vm1403_vm8, %v1392_v18 }
 0x3d1   :  { %v1329_v20 = vpop.f32.mrf.mxu3 }
 0x3d2   :  { %v1760_v22 = vpop.eup %1759  ;;  %v1330_v8 = vadd.f32 %v1329_v20, %v1281_v57 }
 0x3d3   :  { %v1377_v25 = vsel %vm1354_vm2, %v1760_v22, %v1328_v54 }
 0x3d4   :  { %v1393_v23 = vpack.c.bf16 %v1377_v25, %v1377_v25  ;;  %1761 = vtanh.f32 %v1330_v8 }
 0x3d5   :  { %v1283_v28 = vpop.f32.mrf.mxu1 }
 0x3d6   :  { %1410 = vst.msk [vmem:[%s2457_s8 + $0x18] sm:$0xf] %vm1403_vm8, %v1393_v23  ;;  %v1284_v9 = vadd.f32 %v1283_v28, %v2332_v36 }
 0x3d9   :  { %v1332_v30 = vpop.f32.mrf.mxu3 }
 0x3da   :  { %v1762_v33 = vpop.eup %1761  ;;  %v1333_v34 = vadd.f32 %v1332_v30, %v1284_v9 }
 0x3db   :  { %v1378_v35 = vsel %vm1354_vm2, %v1762_v33, %v1330_v8 }
 0x3dc   :  { %v1394_v13 = vpack.c.bf16 %v1378_v35, %v1378_v35  ;;  %1763 = vtanh.f32 %v1333_v34 }
 0x3dd   :  { %v1285_v26 = vpop.f32.mrf.mxu1 }
 0x3de   :  { %1411 = vst.msk [vmem:[%s2457_s8 + $0x1c] sm:$0xf] %vm1403_vm8, %v1394_v13  ;;  %v1286_v31 = vadd.f32 %v1285_v26, %v2332_v36 }
 0x3e1   :  { %v1334_v37 = vpop.f32.mrf.mxu3 }
 0x3e2   :  { %v1764_v39 = vpop.eup %1763  ;;  %v1335_v40 = vadd.f32 %v1334_v37, %v1286_v31 }
 0x3e3   :  { %v1379_v44 = vsel %vm1354_vm2, %v1764_v39, %v1333_v34 }
 0x3e4   :  { %v1395_v42 = vpack.c.bf16 %v1379_v44, %v1379_v44  ;;  %1765 = vtanh.f32 %v1335_v40 }
 0x3e6   :  { %1412 = vst.msk [vmem:[%s2457_s8 + $0x20] sm:$0xf] %vm1403_vm8, %v1395_v42 }
 0x3ea   :  { %v1766_v52 = vpop.eup %1765 }
 0x3eb   :  { %v1380_v45 = vsel %vm1354_vm2, %v1766_v52, %v1335_v40 }
 0x3ec   :  { %v1396_v46 = vpack.c.bf16 %v1380_v45, %v1380_v45 }
 0x3ee   :  { %1413 = vst.msk [vmem:[%s2457_s8 + $0x24] sm:$0xf] %vm1403_vm8, %v1396_v46 }
 0x3f7   :  { %v1288_v49 = vpop.f32.mrf.mxu1  ;;  %v1337_v50 = vpop.f32.mrf.mxu3 }
 0x3f8   :  { %v1289_v43 = vadd.f32 %v1288_v49, %v2332_v36 }
 0x3fa   :  { %v1338_v51 = vadd.f32 %v1337_v50, %v1289_v43 }
 0x3fc   :  { %1767 = vtanh.f32 %v1338_v51 }
 0x3ff   :  { %v1290_v4 = vpop.f32.mrf.mxu1  ;;  %v1339_v41 = vpop.f32.mrf.mxu3 }
 0x400   :  { %v1291_v53 = vadd.f32 %v1290_v4, %v2332_v36 }
 0x402   :  { %v1768_v15 = vpop.eup %1767  ;;  %v1340_v55 = vadd.f32 %v1339_v41, %v1291_v53 }
 0x403   :  { %v1381_v21 = vsel %vm1354_vm2, %v1768_v15, %v1338_v51 }
 0x404   :  { %v1397_v56 = vpack.c.bf16 %v1381_v21, %v1381_v21  ;;  %1769 = vtanh.f32 %v1340_v55 }
 0x406   :  { %1414 = vst.msk [vmem:[%s2457_s8 + $0x28] sm:$0xf] %vm1403_vm8, %v1397_v56 }
 0x407   :  { %v1293_v48 = vpop.f32.mrf.mxu1  ;;  %v1342_v58 = vpop.f32.mrf.mxu3 }
 0x408   :  { %v1294_v29 = vadd.f32 %v1293_v48, %v2332_v36 }
 0x40a   :  { %v1770_v59 = vpop.eup %1769  ;;  %v1343_v16 = vadd.f32 %v1342_v58, %v1294_v29 }
 0x40b   :  { %v1382_v61 = vsel %vm1354_vm2, %v1770_v59, %v1340_v55 }
 0x40c   :  { %v1398_v38 = vpack.c.bf16 %v1382_v61, %v1382_v61  ;;  %1771 = vtanh.f32 %v1343_v16 }
 0x40e   :  { %1415 = vst.msk [vmem:[%s2457_s8 + $0x2c] sm:$0xf] %vm1403_vm8, %v1398_v38 }
 0x40f   :  { %v1295_v62 = vpop.f32.mrf.mxu1  ;;  %v1344_v63 = vpop.f32.mrf.mxu3 }
 0x410   :  { %v1296_v1 = vadd.f32 %v1295_v62, %v2332_v36 }
 0x412   :  { %v1772_v24 = vpop.eup %1771  ;;  %v1345_v2 = vadd.f32 %v1344_v63, %v1296_v1 }
 0x413   :  { %v1383_v5 = vsel %vm1354_vm2, %v1772_v24, %v1343_v16 }
 0x414   :  { %v1399_v3 = vpack.c.bf16 %v1383_v5, %v1383_v5  ;;  %1773 = vtanh.f32 %v1345_v2 }
 0x416   :  { %1416 = vst.msk [vmem:[%s2457_s8 + $0x30] sm:$0xf] %vm1403_vm8, %v1399_v3 }
 0x417   :  { %v1298_v6 = vpop.f32.mrf.mxu1  ;;  %v1347_v32 = vpop.f32.mrf.mxu3 }
 0x418   :  { %v1299_v7 = vadd.f32 %v1298_v6, %v2332_v36 }
 0x41a   :  { %v1774_v10 = vpop.eup %1773  ;;  %v1348_v0 = vadd.f32 %v1347_v32, %v1299_v7 }
 0x41b   :  { %v1384_v27 = vsel %vm1354_vm2, %v1774_v10, %v1345_v2 }
 0x41c   :  { %v1400_v11 = vpack.c.bf16 %v1384_v27, %v1384_v27  ;;  %1775 = vtanh.f32 %v1348_v0 }
 0x41e   :  { %1417 = vst.msk [vmem:[%s2457_s8 + $0x34] sm:$0xf] %vm1403_vm8, %v1400_v11 }
 0x41f   :  { %v1300_v12 = vpop.f32.mrf.mxu1  ;;  %v1349_v14 = vpop.f32.mrf.mxu3 }
 0x420   :  { %v1301_v47 = vadd.f32 %v1300_v12, %v2332_v36 }
 0x422   :  { %v1776_v54 = vpop.eup %1775  ;;  %v1350_v17 = vadd.f32 %v1349_v14, %v1301_v47 }
 0x423   :  { %v1385_v18 = vsel %vm1354_vm2, %v1776_v54, %v1348_v0 }
 0x424   :  { %v1401_v19 = vpack.c.bf16 %v1385_v18, %v1385_v18  ;;  %1777 = vtanh.f32 %v1350_v17 }
 0x426   :  { %1418 = vst.msk [vmem:[%s2457_s8 + $0x38] sm:$0xf] %vm1403_vm8, %v1401_v19 }
 0x42a   :  { %v1778_v57 = vpop.eup %1777 }
 0x42b   :  { %v1386_v20 = vsel %vm1354_vm2, %v1778_v57, %v1350_v17 }
 0x42c   :  { %v1402_v22 = vpack.c.bf16 %v1386_v20, %v1386_v20 }
 0x42e   :  { %1419 = vst.msk [vmem:[%s2457_s8 + $0x3c] sm:$0xf] %vm1403_vm8, %v1402_v22 }

</bundles_post_ra>
